<compile_context>
chip_gen: v7x
topology: tpu7x:2x2x1
jax: 0.10.0
libtpu: 0.0.40
codegen_flags: <defaults>
</compile_context>

<pallas_src>
import functools
import math

import numpy as np
import jax
import jax.numpy as jnp
from jax.experimental import pallas as pl
from jax.experimental.pallas import tpu as pltpu


# ----------------------------------------------------------------------------
# helpers usable both inside and outside kernels
# ----------------------------------------------------------------------------
def _gelu_tanh(x):
    # TODO(synk): PyTorch F.gelu uses the exact erf form; the tanh approximation
    # is used inside the Pallas kernels for Mosaic-safe lowering (small drift).
    c = 0.7978845608028654  # sqrt(2/pi)
    return 0.5 * x * (1.0 + jnp.tanh(c * (x + 0.044715 * x * x * x)))


def _ln_rows(x, g, b, eps=1e-5):
    """LayerNorm over the last dim of a 2-D row block; g, b are (1, dim)."""
    mu = jnp.mean(x, axis=-1, keepdims=True)
    var = jnp.mean(jnp.square(x - mu), axis=-1, keepdims=True)
    return (x - mu) * jax.lax.rsqrt(var + eps) * g + b


def layernorm_lastdim(x, g, b, eps=1e-5):
    mu = x.mean(-1, keepdims=True)
    var = ((x - mu) ** 2).mean(-1, keepdims=True)
    return (x - mu) / jnp.sqrt(var + eps) * g + b


def _causal_mask(L):
    """(1, L, L) bool mask of the strict upper triangle (TriangularCausalMask)."""
    row = jax.lax.broadcasted_iota(jnp.int32, (1, L, L), 1)
    col = jax.lax.broadcasted_iota(jnp.int32, (1, L, L), 2)
    return col > row


def _masked_softmax(s, mask):
    s = jnp.where(mask, -jnp.inf, s)
    s = s - jnp.max(s, axis=-1, keepdims=True)
    p = jnp.exp(s)
    return p / jnp.sum(p, axis=-1, keepdims=True)


def _choose_batch_tile(Bf, L, D):
    """Batch tile per grid step: target ~512 rows, cap f32 intermediates ~2MiB."""
    rows_target = 512
    bb = max(1, rows_target // max(L, 1))
    bytes_per_elem = 4 * L * max(L, 4 * D)          # scores (L,L) / FFN (L,4D)
    bb = min(bb, max(1, (2 << 20) // bytes_per_elem))
    bb = min(bb, 128)                               # bound batched-einsum unroll
    return max(1, min(bb, Bf))


def _pad_batch(x, Bb):
    Bf = x.shape[0]
    n_blk = -(-Bf // Bb)
    pad = n_blk * Bb - Bf
    if pad:
        x = jnp.concatenate([x, jnp.zeros((pad,) + x.shape[1:], x.dtype)], axis=0)
    return x, n_blk


# ----------------------------------------------------------------------------
# Pallas kernel: Attention_Block (self-attention + add&norm + 1x1-conv FFN)
#   packed weights (all matrices stored (in, out)):
#     wm  : (D, 8D)  = [wq | wk | wv | wo | w1]
#     w2  : (4D, D)
#     vec : (1, 13D) = [bq | bk | bv | bo | b1(4D) | b2 | g1 | be1 | g2 | be2]
# ----------------------------------------------------------------------------
def make_attn_block_kernel(Bb, L, D, H):
    E = D // H
    scale = 1.0 / math.sqrt(E)
    f32 = jnp.float32

    def kernel(x_ref, wm_ref, w2_ref, vec_ref, o_ref):
        x = x_ref[...].reshape(Bb * L, D)            # (rows, D)

        bo = vec_ref[:, 3 * D:4 * D]
        b1 = vec_ref[:, 4 * D:8 * D]
        b2 = vec_ref[:, 8 * D:9 * D]
        g1 = vec_ref[:, 9 * D:10 * D]
        be1 = vec_ref[:, 10 * D:11 * D]
        g2 = vec_ref[:, 11 * D:12 * D]
        be2 = vec_ref[:, 12 * D:13 * D]

        mask = _causal_mask(L)

        attn = jnp.zeros((Bb * L, D), f32)
        for h in range(H):                            # static, unrolled (H small)
            lo, hi = h * E, (h + 1) * E
            q = jnp.dot(x, wm_ref[:, lo:hi], preferred_element_type=f32) \
                + vec_ref[:, lo:hi]
            k = jnp.dot(x, wm_ref[:, D + lo:D + hi], preferred_element_type=f32) \
                + vec_ref[:, D + lo:D + hi]
            v = jnp.dot(x, wm_ref[:, 2 * D + lo:2 * D + hi],
                        preferred_element_type=f32) + vec_ref[:, 2 * D + lo:2 * D + hi]
            q3 = q.reshape(Bb, L, E)
            k3 = k.reshape(Bb, L, E)
            v3 = v.reshape(Bb, L, E)
            s = jnp.einsum('ble,bme->blm', q3, k3,
                           preferred_element_type=f32) * scale
            p = _masked_softmax(s, mask)
            ctx = jnp.einsum('blm,bme->ble', p, v3, preferred_element_type=f32)
            # per-head row slice of Wo summed == concat(heads) @ Wo
            attn = attn + jnp.dot(ctx.reshape(Bb * L, E),
                                  wm_ref[lo:hi, 3 * D:4 * D],
                                  preferred_element_type=f32)
        attn = attn + bo

        x1 = _ln_rows(x + attn, g1, be1)
        y = _gelu_tanh(jnp.dot(x1, wm_ref[:, 4 * D:8 * D],
                               preferred_element_type=f32) + b1)     # conv1(1x1)+gelu
        y = jnp.dot(y, w2_ref[...], preferred_element_type=f32) + b2  # conv2(1x1)
        o_ref[...] = _ln_rows(x1 + y, g2, be2).reshape(Bb, L, D)

    return kernel


@functools.lru_cache(maxsize=None)
def _attn_block_callable(Bb, n_blk, L, D, H):
    kern = make_attn_block_kernel(Bb, L, D, H)
    return jax.jit(pl.pallas_call(
        kern,
        grid=(n_blk,),
        in_specs=[
            pl.BlockSpec((Bb, L, D), lambda b: (b, 0, 0)),
            pl.BlockSpec((D, 8 * D), lambda b: (0, 0)),
            pl.BlockSpec((4 * D, D), lambda b: (0, 0)),
            pl.BlockSpec((1, 13 * D), lambda b: (0, 0)),
        ],
        out_specs=pl.BlockSpec((Bb, L, D), lambda b: (b, 0, 0)),
        out_shape=jax.ShapeDtypeStruct((n_blk * Bb, L, D), jnp.float32),
        compiler_params=pltpu.CompilerParams(dimension_semantics=("parallel",)),
    ))


def attention_block_forward(x, packed, n_heads):
    """x: (Bf, L, D) -> (Bf, L, D).  (Attention maps are dead for this config.)"""
    wm, w2, vec = packed
    Bf, L, D = x.shape
    Bb = _choose_batch_tile(Bf, L, D)
    xp, n_blk = _pad_batch(x, Bb)
    fn = _attn_block_callable(Bb, n_blk, L, D, n_heads)
    return fn(xp, wm, w2, vec)[:Bf]


# ----------------------------------------------------------------------------
# Pallas kernel: fused graph branch = adj_build attention maps + GAT ('qkv')
#   adj pack:  am (T, 2T) = [wq|wk], av (1, 2T) = [bq|bk]
#   gat packs: gm (T, 7T) = [W|wq|wk|c1], gc2 (4T, T),
#              gv (1, 12T) = [bW|bq|bk|c1b(4T)|c2b|g1|be1|g2|be2]
# ----------------------------------------------------------------------------
def make_graph_branch_kernel(Bb, N, T, H):
    Eh = T // H
    adj_scale = 1.0 / math.sqrt(Eh)
    gat_scale = 1.0 / math.sqrt(T)       # GAT inner attention has n_heads = 1
    f32 = jnp.float32

    def kernel(x_ref, am_ref, av_ref, gm_ref, gc2_ref, gv_ref, adj_ref, o_ref):
        x = x_ref[...].reshape(Bb * N, T)
        mask = _causal_mask(N)

        # ---- adj_build: only Q/K + softmax are live (block output is discarded) ----
        for h in range(H):
            lo, hi = h * Eh, (h + 1) * Eh
            q = jnp.dot(x, am_ref[:, lo:hi], preferred_element_type=f32) \
                + av_ref[:, lo:hi]
            k = jnp.dot(x, am_ref[:, T + lo:T + hi], preferred_element_type=f32) \
                + av_ref[:, T + lo:T + hi]
            s = jnp.einsum('bne,bme->bnm', q.reshape(Bb, N, Eh), k.reshape(Bb, N, Eh),
                           preferred_element_type=f32) * adj_scale
            adj_ref[:, h, :, :] = _masked_softmax(s, mask)

        # ---- GraphAttentionLayer (qkv variant); inner attention V/out proj are dead ----
        bW = gv_ref[:, 0:T]
        bq = gv_ref[:, T:2 * T]
        bk = gv_ref[:, 2 * T:3 * T]
        c1b = gv_ref[:, 3 * T:7 * T]
        c2b = gv_ref[:, 7 * T:8 * T]
        g1 = gv_ref[:, 8 * T:9 * T]
        be1 = gv_ref[:, 9 * T:10 * T]
        g2 = gv_ref[:, 10 * T:11 * T]
        be2 = gv_ref[:, 11 * T:12 * T]

        Wh = jnp.dot(x, gm_ref[:, 0:T], preferred_element_type=f32) + bW
        q = jnp.dot(Wh, gm_ref[:, T:2 * T], preferred_element_type=f32) + bq
        k = jnp.dot(Wh, gm_ref[:, 2 * T:3 * T], preferred_element_type=f32) + bk
        s = jnp.einsum('bne,bme->bnm', q.reshape(Bb, N, T), k.reshape(Bb, N, T),
                       preferred_element_type=f32) * gat_scale
        e = _masked_softmax(s, mask)                 # inner attention map (1 head)
        # reference: attention = softmax(e.mean(heads)) -> double softmax by design
        a = e - jnp.max(e, axis=-1, keepdims=True)
        a = jnp.exp(a)
        a = a / jnp.sum(a, axis=-1, keepdims=True)
        h_prime = jnp.einsum('bnm,bmt->bnt', a, Wh.reshape(Bb, N, T),
                             preferred_element_type=f32)
        x1 = _ln_rows(h_prime.reshape(Bb * N, T) + x, g1, be1)
        y = jnp.maximum(jnp.dot(x1, gm_ref[:, 3 * T:7 * T],
                                preferred_element_type=f32) + c1b, 0.0)   # relu
        y = jnp.dot(y, gc2_ref[...], preferred_element_type=f32) + c2b
        o_ref[...] = _ln_rows(x1 + y, g2, be2).reshape(Bb, N, T)

    return kernel


@functools.lru_cache(maxsize=None)
def _graph_branch_callable(Bb, n_blk, N, T, H):
    kern = make_graph_branch_kernel(Bb, N, T, H)
    return jax.jit(pl.pallas_call(
        kern,
        grid=(n_blk,),
        in_specs=[
            pl.BlockSpec((Bb, N, T), lambda b: (b, 0, 0)),
            pl.BlockSpec((T, 2 * T), lambda b: (0, 0)),
            pl.BlockSpec((1, 2 * T), lambda b: (0, 0)),
            pl.BlockSpec((T, 7 * T), lambda b: (0, 0)),
            pl.BlockSpec((4 * T, T), lambda b: (0, 0)),
            pl.BlockSpec((1, 12 * T), lambda b: (0, 0)),
        ],
        out_specs=(
            pl.BlockSpec((Bb, H, N, N), lambda b: (b, 0, 0, 0)),
            pl.BlockSpec((Bb, N, T), lambda b: (b, 0, 0)),
        ),
        out_shape=(
            jax.ShapeDtypeStruct((n_blk * Bb, H, N, N), jnp.float32),
            jax.ShapeDtypeStruct((n_blk * Bb, N, T), jnp.float32),
        ),
        compiler_params=pltpu.CompilerParams(dimension_semantics=("parallel",)),
    ))


def graph_branch_forward(x, adj_packed, gat_packed, n_heads):
    """x: (Bf, N, T) -> (adj maps (Bf, H, N, N), gat output (Bf, N, T))."""
    am, av = adj_packed
    gm, gc2, gv = gat_packed
    Bf, N, T = x.shape
    Bb = _choose_batch_tile(Bf, N, T)
    xp, n_blk = _pad_batch(x, Bb)
    fn = _graph_branch_callable(Bb, n_blk, N, T, n_heads)
    adj, out = fn(xp, am, av, gm, gc2, gv)
    return adj[:Bf], out[:Bf]


# ----------------------------------------------------------------------------
# plain-JAX glue pieces
# ----------------------------------------------------------------------------
def memory_module(queries, mem):
    # TODO(synk): MemoryModule source not provided; standard read-and-concat
    # memory (attn = softmax(q @ mem^T), output = [q, attn @ mem]) is used.
    attn = jax.nn.softmax(queries @ mem.T, axis=-1)
    read = attn @ mem
    return jnp.concatenate([queries, read], axis=-1), attn


def gumbel_softmax(logits, tau, key):
    # TODO(synk): F.gumbel_softmax is stochastic; gumbel noise drawn from a
    # fixed PRNGKey keeps the script deterministic.
    u = jax.random.uniform(key, logits.shape,
                           minval=jnp.finfo(jnp.float32).tiny, maxval=1.0)
    g = -jnp.log(-jnp.log(u))
    return jax.nn.softmax((logits + g) / tau, axis=-1)


def fft_for_period(x, k):
    # TODO(synk): one device->host sync is unavoidable here: the top-k periods
    # become *static* reshape shapes (the reference also does .cpu().numpy()).
    xf = jnp.fft.rfft(x, axis=1)
    amp = jnp.abs(xf)
    freq = amp.mean(0).mean(-1)
    freq = freq.at[0].set(0.0)
    _, top_idx = jax.lax.top_k(freq, k)
    top_idx_np = np.asarray(jax.device_get(top_idx))
    period = x.shape[1] // top_idx_np
    return period, amp.mean(-1)[:, top_idx_np]


# ----------------------------------------------------------------------------
# ScaleGraphBlock forward (configs: gat_type='qkv', multi_scale_type='true',
# adj_fusion_source='adj', adj_fusion_type='mem',
# encode_feature_type='patch_inter_metric_gat')
# ----------------------------------------------------------------------------
def scale_graph_block_forward(x, params, cfg, key):
    B, T, N = x.shape
    H = cfg['n_heads']
    k_top = cfg['top_k']
    max_scale = T
    gelu_exact = lambda a: jax.nn.gelu(a, approximate=False)   # outer nn.GELU

    scale_list, scale_weight = fft_for_period(x, k_top)

    res, res_adj, res_graph_queries, length_list = [], [], [], []
    keys = jax.random.split(key, 2 * k_top)

    for i in range(k_top):
        scale = int(scale_list[i])
        if T % scale != 0:
            L = T // scale + 1
            pad = jnp.zeros((B, L * scale - T, N), x.dtype)
            out = jnp.concatenate([x, pad], axis=1)
        else:
            L = T // scale
            out = x
        length_list.append(L)
        out = out.reshape(B, L, scale, N)
        out = jnp.concatenate(
            [out, jnp.zeros((B, L, max_scale - scale, N), x.dtype)], axis=2)  # (B,L,T,N)

        # ----- fused graph branch: adj_build attention maps + GAT (one launch) -----
        g_in = out.reshape(-1, max_scale, N).transpose(0, 2, 1)        # (B*L, N, T)
        adj, out4 = graph_branch_forward(g_in, params['adj_qk'], params['gat'], H)

        # adj_fusion_source == 'adj'
        adj = adj.transpose(0, 2, 3, 1)
        adj = gumbel_softmax(adj, cfg['t'], keys[2 * i])
        adj = adj.transpose(0, 3, 1, 2)
        graph_queries = adj.reshape(-1, H * N * N)
        mem_out, _ = memory_module(graph_queries, params['memory'])
        adj = mem_out[:, H * N * N:].reshape(-1, H, N, N)              # fusion 'mem'
        res_graph_queries.append(
            graph_queries.reshape(B, -1, H, N, N).transpose(1, 0, 2, 3, 4))
        adj = adj.transpose(0, 2, 3, 1)
        adj = gumbel_softmax(adj, cfg['t'], keys[2 * i + 1])
        adj = adj[..., :H - 1].max(axis=-1)                            # (B*L, N, N)
        res_adj.append(adj.reshape(B, L, N, N).transpose(1, 0, 2, 3))
        out4 = out4.reshape(B, -1, N, max_scale).transpose(0, 1, 3, 2)  # (B, L, T, N)

        # ----- intra-patch (time) attention: att0, then outer exact-erf GELU -----
        out1 = attention_block_forward(
            out.reshape(-1, max_scale, N), params['att0'], H)
        out1 = gelu_exact(out1).reshape(B, -1, max_scale, N)

        # NOTE: the reference also computes out3 = self.att2(...) here, but for
        # encode_feature_type == 'patch_inter_metric_gat' that result is never
        # used, so the dead computation (and its launch) is skipped.

        # ----- inter-patch attention: att1 -----
        out2 = attention_block_forward(
            out.transpose(0, 2, 1, 3).reshape(B * max_scale, -1, N),
            params['att1'], H)
        out2 = gelu_exact(out2).reshape(B, max_scale, -1, N).transpose(0, 2, 1, 3)

        # encode_feature_type == 'patch_inter_metric_gat'
        out = out1 + out + out2 + out4
        out = layernorm_lastdim(out, params['norm_g'], params['norm_b'])
        out = out[:, :, :scale, :].reshape(B, -1, N)[:, :T, :]
        res.append(out)

    res = jnp.stack(res, axis=-1)                                      # (B,T,N,k)
    res_with_dim = res
    res_adj_out = jnp.concatenate(res_adj, axis=0).reshape(-1, N * N)
    res_graph_queries_out = jnp.concatenate(
        res_graph_queries, axis=0).reshape(-1, H * N * N)
    sw = jax.nn.softmax(scale_weight, axis=1)[:, None, None, :]
    res_final = jnp.sum(res * sw, axis=-1)

    return {'res_with_dim': res_with_dim, 'res': res_final,
            'res_adj': res_adj_out, 'scale_list': scale_list,
            'length_list': length_list,
            'res_graph_queries': res_graph_queries_out,
            'res_edge_queries': None}


# ----------------------------------------------------------------------------
# deterministic parameter initialization (raw PyTorch layouts) + host packing
# ----------------------------------------------------------------------------
def init_linear(key, out_dim, in_dim, scale=0.1):
    k1, k2 = jax.random.split(key)
    w = jax.random.normal(k1, (out_dim, in_dim), jnp.float32) * scale
    b = jax.random.normal(k2, (1, out_dim), jnp.float32) * scale
    return w, b


def init_attention_block(key, d_model):
    d_ff = 4 * d_model
    ks = jax.random.split(key, 6)
    p = {}
    p['wq'], p['bq'] = init_linear(ks[0], d_model, d_model)
    p['wk'], p['bk'] = init_linear(ks[1], d_model, d_model)
    p['wv'], p['bv'] = init_linear(ks[2], d_model, d_model)
    p['wo'], p['bo'] = init_linear(ks[3], d_model, d_model)
    p['w1'], p['b1'] = init_linear(ks[4], d_ff, d_model)     # conv1 (1x1)
    p['w2'], p['b2'] = init_linear(ks[5], d_model, d_ff)     # conv2 (1x1)
    p['g1'] = jnp.ones((1, d_model), jnp.float32)
    p['be1'] = jnp.zeros((1, d_model), jnp.float32)
    p['g2'] = jnp.ones((1, d_model), jnp.float32)
    p['be2'] = jnp.zeros((1, d_model), jnp.float32)
    return p


def init_gat(key, T):
    d_ff = 4 * T
    ks = jax.random.split(key, 5)
    p = {}
    p['W'], p['bW'] = init_linear(ks[0], T, T)
    p['wq'], p['bq'] = init_linear(ks[1], T, T)
    p['wk'], p['bk'] = init_linear(ks[2], T, T)
    p['c1'], p['c1b'] = init_linear(ks[3], d_ff, T)
    p['c2'], p['c2b'] = init_linear(ks[4], T, d_ff)
    p['g1'] = jnp.ones((1, T), jnp.float32)
    p['be1'] = jnp.zeros((1, T), jnp.float32)
    p['g2'] = jnp.ones((1, T), jnp.float32)
    p['be2'] = jnp.zeros((1, T), jnp.float32)
    return p


def pack_attention_block(p):
    """Host-side layout plumbing: (in,out) matrices, consolidated into 3 arrays."""
    wm = jnp.concatenate([p['wq'].T, p['wk'].T, p['wv'].T, p['wo'].T, p['w1'].T],
                         axis=1)                                    # (D, 8D)
    w2 = jnp.asarray(p['w2'].T)                                     # (4D, D)
    vec = jnp.concatenate([p['bq'], p['bk'], p['bv'], p['bo'], p['b1'], p['b2'],
                           p['g1'], p['be1'], p['g2'], p['be2']], axis=1)  # (1, 13D)
    return wm, w2, vec


def pack_adj_qk(p):
    """adj_build: only Q/K projections are live (its block output is discarded)."""
    am = jnp.concatenate([p['wq'].T, p['wk'].T], axis=1)            # (T, 2T)
    av = jnp.concatenate([p['bq'], p['bk']], axis=1)                # (1, 2T)
    return am, av


def pack_gat(p):
    gm = jnp.concatenate([p['W'].T, p['wq'].T, p['wk'].T, p['c1'].T], axis=1)  # (T,7T)
    gc2 = jnp.asarray(p['c2'].T)                                    # (4T, T)
    gv = jnp.concatenate([p['bW'], p['bq'], p['bk'], p['c1b'], p['c2b'],
                          p['g1'], p['be1'], p['g2'], p['be2']], axis=1)       # (1,12T)
    return gm, gc2, gv


def init_params(key, cfg):
    N, T, H = cfg['input_c'], cfg['seq_len'], cfg['n_heads']
    ks = jax.random.split(key, 5)
    att0 = init_attention_block(ks[0], N)
    att1 = init_attention_block(ks[1], N)
    adj = init_attention_block(ks[2], T)
    gat = init_gat(ks[3], T)
    return {
        'att0': pack_attention_block(att0),
        'att1': pack_attention_block(att1),
        'adj_qk': pack_adj_qk(adj),
        'gat': pack_gat(gat),
        'memory': jax.random.normal(ks[4], (cfg['n_memory'], H * N * N),
                                    jnp.float32) * 0.1,
        'norm_g': jnp.ones((N,), jnp.float32),
        'norm_b': jnp.zeros((N,), jnp.float32),
    }


# ----------------------------------------------------------------------------
if __name__ == "__main__":
    cfg = dict(seq_len=8, input_c=4, n_heads=2, top_k=2, n_memory=8, t=1e-5)
    key = jax.random.PRNGKey(0)
    kx, kp, kg = jax.random.split(key, 3)
    x = jax.random.normal(kx, (2, cfg['seq_len'], cfg['input_c']), jnp.float32)
    params = init_params(kp, cfg)

    out = scale_graph_block_forward(x, params, cfg, kg)

    jax.tree_util.tree_map(
        lambda a: jax.block_until_ready(a) if isinstance(a, jax.Array) else a,
        out)
    assert out['res'].shape == (2, cfg['seq_len'], cfg['input_c'])
    assert out['res_with_dim'].shape == (2, cfg['seq_len'], cfg['input_c'],
                                         cfg['top_k'])
    print("KERNEL_OK")
</pallas_src>

<mosaic_0001>
module attributes {stable_mosaic.version = 11 : i64} {
  func.func @kernel(%arg0: i32, %arg1: memref<8x4x8xf32, #tpu.memory_space<vmem>>, %arg2: memref<8x16xf32, #tpu.memory_space<vmem>>, %arg3: memref<1x16xf32, #tpu.memory_space<vmem>>, %arg4: memref<8x56xf32, #tpu.memory_space<vmem>>, %arg5: memref<32x8xf32, #tpu.memory_space<vmem>>, %arg6: memref<1x96xf32, #tpu.memory_space<vmem>>, %arg7: memref<8x2x4x4xf32, #tpu.memory_space<vmem>>, %arg8: memref<8x4x8xf32, #tpu.memory_space<vmem>>) attributes {dimension_semantics = [#tpu.dimension_semantics<parallel>], iteration_bounds = array<i64: 1>, scalar_prefetch = 0 : i64, scratch_operands = 0 : i64, tpu.core_type = #tpu.core_type<tc>, window_params = [{transform_indices = @transform_0, window_bounds = array<i64: 8, 4, 8>}, {pipeline_mode = #tpu.pipeline_mode<synchronous>, transform_indices = @transform_1, window_bounds = array<i64: 8, 16>}, {pipeline_mode = #tpu.pipeline_mode<synchronous>, transform_indices = @transform_2, window_bounds = array<i64: 1, 16>}, {pipeline_mode = #tpu.pipeline_mode<synchronous>, transform_indices = @transform_3, window_bounds = array<i64: 8, 56>}, {pipeline_mode = #tpu.pipeline_mode<synchronous>, transform_indices = @transform_4, window_bounds = array<i64: 32, 8>}, {pipeline_mode = #tpu.pipeline_mode<synchronous>, transform_indices = @transform_5, window_bounds = array<i64: 1, 96>}, {transform_indices = @transform_6, window_bounds = array<i64: 8, 2, 4, 4>}, {transform_indices = @transform_7, window_bounds = array<i64: 8, 4, 8>}]} {
    %c0 = arith.constant 0 : index
    %c0_0 = arith.constant 0 : index
    %c0_1 = arith.constant 0 : index
    %0 = vector.load %arg1[%c0, %c0_0, %c0_1] : memref<8x4x8xf32, #tpu.memory_space<vmem>>, vector<8x4x8xf32>
    %1 = vector.shape_cast %0 : vector<8x4x8xf32> to vector<32x8xf32>
    %2 = tpu.iota {dimensions = array<i32: 1>} : vector<1x4x4xi32>
    %3 = tpu.iota {dimensions = array<i32: 2>} : vector<1x4x4xi32>
    %4 = arith.cmpi sgt, %3, %2 : vector<1x4x4xi32>
    %c0_2 = arith.constant 0 : index
    %c0_3 = arith.constant 0 : index
    %5 = vector.load %arg2[%c0_2, %c0_3] : memref<8x16xf32, #tpu.memory_space<vmem>>, vector<8x4xf32>
    %cst = arith.constant dense<0.000000e+00> : vector<32x4xf32>
    %6 = tpu.matmul %1, %5, %cst {dimension_numbers = #tpu.dot_dimension_numbers<[1], [0], [0], [1], [0, 0, 1, 1], [], []>} : vector<32x8xf32>, vector<8x4xf32>, vector<32x4xf32> -> vector<32x4xf32>
    %c0_4 = arith.constant 0 : index
    %c0_5 = arith.constant 0 : index
    %7 = vector.load %arg3[%c0_4, %c0_5] : memref<1x16xf32, #tpu.memory_space<vmem>>, vector<1x4xf32>
    %8 = vector.broadcast %7 : vector<1x4xf32> to vector<32x4xf32>
    %9 = arith.addf %6, %8 : vector<32x4xf32>
    %c0_6 = arith.constant 0 : index
    %c8 = arith.constant 8 : index
    %10 = vector.load %arg2[%c0_6, %c8] : memref<8x16xf32, #tpu.memory_space<vmem>>, vector<8x4xf32>
    %cst_7 = arith.constant dense<0.000000e+00> : vector<32x4xf32>
    %11 = tpu.matmul %1, %10, %cst_7 {dimension_numbers = #tpu.dot_dimension_numbers<[1], [0], [0], [1], [0, 0, 1, 1], [], []>} : vector<32x8xf32>, vector<8x4xf32>, vector<32x4xf32> -> vector<32x4xf32>
    %c0_8 = arith.constant 0 : index
    %c8_9 = arith.constant 8 : index
    %12 = vector.load %arg3[%c0_8, %c8_9] : memref<1x16xf32, #tpu.memory_space<vmem>>, vector<1x4xf32>
    %13 = vector.broadcast %12 : vector<1x4xf32> to vector<32x4xf32>
    %14 = arith.addf %11, %13 : vector<32x4xf32>
    %15 = vector.shape_cast %9 : vector<32x4xf32> to vector<8x4x4xf32>
    %16 = vector.shape_cast %14 : vector<32x4xf32> to vector<8x4x4xf32>
    "tpu.trace_start"() <{level = 10 : i32, message = "bne,bme->bnm"}> : () -> ()
    %cst_10 = arith.constant dense<0.000000e+00> : vector<8x4x4xf32>
    %17 = tpu.matmul %15, %16, %cst_10 {dimension_numbers = #tpu.dot_dimension_numbers<[2], [2], [1], [1], [0, 0, 0, 1, 1, 1], [0], [0]>} : vector<8x4x4xf32>, vector<8x4x4xf32>, vector<8x4x4xf32> -> vector<8x4x4xf32>
    "tpu.trace_stop"() : () -> ()
    %cst_11 = arith.constant 5.000000e-01 : f32
    %18 = vector.broadcast %cst_11 : f32 to vector<8x4x4xf32>
    %19 = arith.mulf %17, %18 : vector<8x4x4xf32>
    %cst_12 = arith.constant 0xFF800000 : f32
    %20 = vector.shape_cast %4 : vector<1x4x4xi1> to vector<1x4x4xi1>
    %21 = vector.broadcast %20 : vector<1x4x4xi1> to vector<8x4x4xi1>
    %22 = vector.broadcast %cst_12 : f32 to vector<8x4x4xf32>
    %23 = arith.select %21, %22, %19 : vector<8x4x4xi1>, vector<8x4x4xf32>
    %cst_13 = arith.constant dense<0xFF800000> : vector<8x4xf32>
    %24 = vector.multi_reduction <maximumf>, %23, %cst_13 [2] : vector<8x4x4xf32> to vector<8x4xf32>
    %25 = vector.shape_cast %24 : vector<8x4xf32> to vector<8x4x1xf32>
    %26 = vector.broadcast %25 : vector<8x4x1xf32> to vector<8x4x4xf32>
    %27 = arith.subf %23, %26 : vector<8x4x4xf32>
    %28 = math.exp %27 : vector<8x4x4xf32>
    %cst_14 = arith.constant dense<0.000000e+00> : vector<8x4xf32>
    %29 = vector.multi_reduction <add>, %28, %cst_14 [2] : vector<8x4x4xf32> to vector<8x4xf32>
    %30 = vector.shape_cast %29 : vector<8x4xf32> to vector<8x4x1xf32>
    %31 = vector.broadcast %30 : vector<8x4x1xf32> to vector<8x4x4xf32>
    %32 = arith.divf %28, %31 : vector<8x4x4xf32>
    %c0_15 = arith.constant 0 : index
    %c0_16 = arith.constant 0 : index
    %c0_17 = arith.constant 0 : index
    %c0_18 = arith.constant 0 : index
    %33 = vector.load %arg7[%c0_15, %c0_16, %c0_17, %c0_18] : memref<8x2x4x4xf32, #tpu.memory_space<vmem>>, vector<8x1x4x4xf32>
    %34 = vector.shape_cast %33 : vector<8x1x4x4xf32> to vector<8x4x4xf32>
    %35 = vector.shape_cast %32 : vector<8x4x4xf32> to vector<8x1x4x4xf32>
    tpu.vector_store %arg7[%c0_15, %c0_16, %c0_17, %c0_18], %35 {strides = array<i32>} : memref<8x2x4x4xf32, #tpu.memory_space<vmem>>, vector<8x1x4x4xf32>,
    %c0_19 = arith.constant 0 : index
    %c4 = arith.constant 4 : index
    %36 = vector.load %arg2[%c0_19, %c4] : memref<8x16xf32, #tpu.memory_space<vmem>>, vector<8x4xf32>
    %cst_20 = arith.constant dense<0.000000e+00> : vector<32x4xf32>
    %37 = tpu.matmul %1, %36, %cst_20 {dimension_numbers = #tpu.dot_dimension_numbers<[1], [0], [0], [1], [0, 0, 1, 1], [], []>} : vector<32x8xf32>, vector<8x4xf32>, vector<32x4xf32> -> vector<32x4xf32>
    %c0_21 = arith.constant 0 : index
    %c4_22 = arith.constant 4 : index
    %38 = vector.load %arg3[%c0_21, %c4_22] : memref<1x16xf32, #tpu.memory_space<vmem>>, vector<1x4xf32>
    %39 = vector.broadcast %38 : vector<1x4xf32> to vector<32x4xf32>
    %40 = arith.addf %37, %39 : vector<32x4xf32>
    %c0_23 = arith.constant 0 : index
    %c12 = arith.constant 12 : index
    %41 = vector.load %arg2[%c0_23, %c12] : memref<8x16xf32, #tpu.memory_space<vmem>>, vector<8x4xf32>
    %cst_24 = arith.constant dense<0.000000e+00> : vector<32x4xf32>
    %42 = tpu.matmul %1, %41, %cst_24 {dimension_numbers = #tpu.dot_dimension_numbers<[1], [0], [0], [1], [0, 0, 1, 1], [], []>} : vector<32x8xf32>, vector<8x4xf32>, vector<32x4xf32> -> vector<32x4xf32>
    %c0_25 = arith.constant 0 : index
    %c12_26 = arith.constant 12 : index
    %43 = vector.load %arg3[%c0_25, %c12_26] : memref<1x16xf32, #tpu.memory_space<vmem>>, vector<1x4xf32>
    %44 = vector.broadcast %43 : vector<1x4xf32> to vector<32x4xf32>
    %45 = arith.addf %42, %44 : vector<32x4xf32>
    %46 = vector.shape_cast %40 : vector<32x4xf32> to vector<8x4x4xf32>
    %47 = vector.shape_cast %45 : vector<32x4xf32> to vector<8x4x4xf32>
    "tpu.trace_start"() <{level = 10 : i32, message = "bne,bme->bnm"}> : () -> ()
    %cst_27 = arith.constant dense<0.000000e+00> : vector<8x4x4xf32>
    %48 = tpu.matmul %46, %47, %cst_27 {dimension_numbers = #tpu.dot_dimension_numbers<[2], [2], [1], [1], [0, 0, 0, 1, 1, 1], [0], [0]>} : vector<8x4x4xf32>, vector<8x4x4xf32>, vector<8x4x4xf32> -> vector<8x4x4xf32>
    "tpu.trace_stop"() : () -> ()
    %cst_28 = arith.constant 5.000000e-01 : f32
    %49 = vector.broadcast %cst_28 : f32 to vector<8x4x4xf32>
    %50 = arith.mulf %48, %49 : vector<8x4x4xf32>
    %cst_29 = arith.constant 0xFF800000 : f32
    %51 = vector.shape_cast %4 : vector<1x4x4xi1> to vector<1x4x4xi1>
    %52 = vector.broadcast %51 : vector<1x4x4xi1> to vector<8x4x4xi1>
    %53 = vector.broadcast %cst_29 : f32 to vector<8x4x4xf32>
    %54 = arith.select %52, %53, %50 : vector<8x4x4xi1>, vector<8x4x4xf32>
    %cst_30 = arith.constant dense<0xFF800000> : vector<8x4xf32>
    %55 = vector.multi_reduction <maximumf>, %54, %cst_30 [2] : vector<8x4x4xf32> to vector<8x4xf32>
    %56 = vector.shape_cast %55 : vector<8x4xf32> to vector<8x4x1xf32>
    %57 = vector.broadcast %56 : vector<8x4x1xf32> to vector<8x4x4xf32>
    %58 = arith.subf %54, %57 : vector<8x4x4xf32>
    %59 = math.exp %58 : vector<8x4x4xf32>
    %cst_31 = arith.constant dense<0.000000e+00> : vector<8x4xf32>
    %60 = vector.multi_reduction <add>, %59, %cst_31 [2] : vector<8x4x4xf32> to vector<8x4xf32>
    %61 = vector.shape_cast %60 : vector<8x4xf32> to vector<8x4x1xf32>
    %62 = vector.broadcast %61 : vector<8x4x1xf32> to vector<8x4x4xf32>
    %63 = arith.divf %59, %62 : vector<8x4x4xf32>
    %c0_32 = arith.constant 0 : index
    %c1 = arith.constant 1 : index
    %c0_33 = arith.constant 0 : index
    %c0_34 = arith.constant 0 : index
    %64 = vector.load %arg7[%c0_32, %c1, %c0_33, %c0_34] : memref<8x2x4x4xf32, #tpu.memory_space<vmem>>, vector<8x1x4x4xf32>
    %65 = vector.shape_cast %64 : vector<8x1x4x4xf32> to vector<8x4x4xf32>
    %66 = vector.shape_cast %63 : vector<8x4x4xf32> to vector<8x1x4x4xf32>
    tpu.vector_store %arg7[%c0_32, %c1, %c0_33, %c0_34], %66 {strides = array<i32>} : memref<8x2x4x4xf32, #tpu.memory_space<vmem>>, vector<8x1x4x4xf32>,
    %c0_35 = arith.constant 0 : index
    %c0_36 = arith.constant 0 : index
    %67 = vector.load %arg6[%c0_35, %c0_36] : memref<1x96xf32, #tpu.memory_space<vmem>>, vector<1x8xf32>
    %c0_37 = arith.constant 0 : index
    %c8_38 = arith.constant 8 : index
    %68 = vector.load %arg6[%c0_37, %c8_38] : memref<1x96xf32, #tpu.memory_space<vmem>>, vector<1x8xf32>
    %c0_39 = arith.constant 0 : index
    %c16 = arith.constant 16 : index
    %69 = vector.load %arg6[%c0_39, %c16] : memref<1x96xf32, #tpu.memory_space<vmem>>, vector<1x8xf32>
    %c0_40 = arith.constant 0 : index
    %c24 = arith.constant 24 : index
    %70 = vector.load %arg6[%c0_40, %c24] : memref<1x96xf32, #tpu.memory_space<vmem>>, vector<1x32xf32>
    %c0_41 = arith.constant 0 : index
    %c56 = arith.constant 56 : index
    %71 = vector.load %arg6[%c0_41, %c56] : memref<1x96xf32, #tpu.memory_space<vmem>>, vector<1x8xf32>
    %c0_42 = arith.constant 0 : index
    %c64 = arith.constant 64 : index
    %72 = vector.load %arg6[%c0_42, %c64] : memref<1x96xf32, #tpu.memory_space<vmem>>, vector<1x8xf32>
    %c0_43 = arith.constant 0 : index
    %c72 = arith.constant 72 : index
    %73 = vector.load %arg6[%c0_43, %c72] : memref<1x96xf32, #tpu.memory_space<vmem>>, vector<1x8xf32>
    %c0_44 = arith.constant 0 : index
    %c80 = arith.constant 80 : index
    %74 = vector.load %arg6[%c0_44, %c80] : memref<1x96xf32, #tpu.memory_space<vmem>>, vector<1x8xf32>
    %c0_45 = arith.constant 0 : index
    %c88 = arith.constant 88 : index
    %75 = vector.load %arg6[%c0_45, %c88] : memref<1x96xf32, #tpu.memory_space<vmem>>, vector<1x8xf32>
    %c0_46 = arith.constant 0 : index
    %c0_47 = arith.constant 0 : index
    %76 = vector.load %arg4[%c0_46, %c0_47] : memref<8x56xf32, #tpu.memory_space<vmem>>, vector<8x8xf32>
    %cst_48 = arith.constant dense<0.000000e+00> : vector<32x8xf32>
    %77 = tpu.matmul %1, %76, %cst_48 {dimension_numbers = #tpu.dot_dimension_numbers<[1], [0], [0], [1], [0, 0, 1, 1], [], []>} : vector<32x8xf32>, vector<8x8xf32>, vector<32x8xf32> -> vector<32x8xf32>
    %78 = vector.broadcast %67 : vector<1x8xf32> to vector<32x8xf32>
    %79 = arith.addf %77, %78 : vector<32x8xf32>
    %c0_49 = arith.constant 0 : index
    %c8_50 = arith.constant 8 : index
    %80 = vector.load %arg4[%c0_49, %c8_50] : memref<8x56xf32, #tpu.memory_space<vmem>>, vector<8x8xf32>
    %cst_51 = arith.constant dense<0.000000e+00> : vector<32x8xf32>
    %81 = tpu.matmul %79, %80, %cst_51 {dimension_numbers = #tpu.dot_dimension_numbers<[1], [0], [0], [1], [0, 0, 1, 1], [], []>} : vector<32x8xf32>, vector<8x8xf32>, vector<32x8xf32> -> vector<32x8xf32>
    %82 = vector.broadcast %68 : vector<1x8xf32> to vector<32x8xf32>
    %83 = arith.addf %81, %82 : vector<32x8xf32>
    %c0_52 = arith.constant 0 : index
    %c16_53 = arith.constant 16 : index
    %84 = vector.load %arg4[%c0_52, %c16_53] : memref<8x56xf32, #tpu.memory_space<vmem>>, vector<8x8xf32>
    %cst_54 = arith.constant dense<0.000000e+00> : vector<32x8xf32>
    %85 = tpu.matmul %79, %84, %cst_54 {dimension_numbers = #tpu.dot_dimension_numbers<[1], [0], [0], [1], [0, 0, 1, 1], [], []>} : vector<32x8xf32>, vector<8x8xf32>, vector<32x8xf32> -> vector<32x8xf32>
    %86 = vector.broadcast %69 : vector<1x8xf32> to vector<32x8xf32>
    %87 = arith.addf %85, %86 : vector<32x8xf32>
    %88 = vector.shape_cast %83 : vector<32x8xf32> to vector<8x4x8xf32>
    %89 = vector.shape_cast %87 : vector<32x8xf32> to vector<8x4x8xf32>
    "tpu.trace_start"() <{level = 10 : i32, message = "bne,bme->bnm"}> : () -> ()
    %cst_55 = arith.constant dense<0.000000e+00> : vector<8x4x4xf32>
    %90 = tpu.matmul %88, %89, %cst_55 {dimension_numbers = #tpu.dot_dimension_numbers<[2], [2], [1], [1], [0, 0, 0, 1, 1, 1], [0], [0]>} : vector<8x4x8xf32>, vector<8x4x8xf32>, vector<8x4x4xf32> -> vector<8x4x4xf32>
    "tpu.trace_stop"() : () -> ()
    %cst_56 = arith.constant 0.353553385 : f32
    %91 = vector.broadcast %cst_56 : f32 to vector<8x4x4xf32>
    %92 = arith.mulf %90, %91 : vector<8x4x4xf32>
    %cst_57 = arith.constant 0xFF800000 : f32
    %93 = vector.shape_cast %4 : vector<1x4x4xi1> to vector<1x4x4xi1>
    %94 = vector.broadcast %93 : vector<1x4x4xi1> to vector<8x4x4xi1>
    %95 = vector.broadcast %cst_57 : f32 to vector<8x4x4xf32>
    %96 = arith.select %94, %95, %92 : vector<8x4x4xi1>, vector<8x4x4xf32>
    %cst_58 = arith.constant dense<0xFF800000> : vector<8x4xf32>
    %97 = vector.multi_reduction <maximumf>, %96, %cst_58 [2] : vector<8x4x4xf32> to vector<8x4xf32>
    %98 = vector.shape_cast %97 : vector<8x4xf32> to vector<8x4x1xf32>
    %99 = vector.broadcast %98 : vector<8x4x1xf32> to vector<8x4x4xf32>
    %100 = arith.subf %96, %99 : vector<8x4x4xf32>
    %101 = math.exp %100 : vector<8x4x4xf32>
    %cst_59 = arith.constant dense<0.000000e+00> : vector<8x4xf32>
    %102 = vector.multi_reduction <add>, %101, %cst_59 [2] : vector<8x4x4xf32> to vector<8x4xf32>
    %103 = vector.shape_cast %102 : vector<8x4xf32> to vector<8x4x1xf32>
    %104 = vector.broadcast %103 : vector<8x4x1xf32> to vector<8x4x4xf32>
    %105 = arith.divf %101, %104 : vector<8x4x4xf32>
    %cst_60 = arith.constant dense<0xFF800000> : vector<8x4xf32>
    %106 = vector.multi_reduction <maximumf>, %105, %cst_60 [2] : vector<8x4x4xf32> to vector<8x4xf32>
    %107 = vector.shape_cast %106 : vector<8x4xf32> to vector<8x4x1xf32>
    %108 = vector.broadcast %107 : vector<8x4x1xf32> to vector<8x4x4xf32>
    %109 = arith.subf %105, %108 : vector<8x4x4xf32>
    %110 = math.exp %109 : vector<8x4x4xf32>
    %cst_61 = arith.constant dense<0.000000e+00> : vector<8x4xf32>
    %111 = vector.multi_reduction <add>, %110, %cst_61 [2] : vector<8x4x4xf32> to vector<8x4xf32>
    %112 = vector.shape_cast %111 : vector<8x4xf32> to vector<8x4x1xf32>
    %113 = vector.broadcast %112 : vector<8x4x1xf32> to vector<8x4x4xf32>
    %114 = arith.divf %110, %113 : vector<8x4x4xf32>
    %115 = vector.shape_cast %79 : vector<32x8xf32> to vector<8x4x8xf32>
    "tpu.trace_start"() <{level = 10 : i32, message = "bnm,bmt->bnt"}> : () -> ()
    %cst_62 = arith.constant dense<0.000000e+00> : vector<8x4x8xf32>
    %116 = tpu.matmul %114, %115, %cst_62 {dimension_numbers = #tpu.dot_dimension_numbers<[2], [1], [1], [2], [0, 0, 0, 1, 1, 2], [0], [0]>} : vector<8x4x4xf32>, vector<8x4x8xf32>, vector<8x4x8xf32> -> vector<8x4x8xf32>
    "tpu.trace_stop"() : () -> ()
    %117 = vector.shape_cast %116 : vector<8x4x8xf32> to vector<32x8xf32>
    %118 = arith.addf %117, %1 : vector<32x8xf32>
    %cst_63 = arith.constant dense<0.000000e+00> : vector<32xf32>
    %119 = vector.multi_reduction <add>, %118, %cst_63 [1] : vector<32x8xf32> to vector<32xf32>
    %120 = vector.shape_cast %119 : vector<32xf32> to vector<32x1xf32>
    %cst_64 = arith.constant 8.000000e+00 : f32
    %121 = vector.broadcast %cst_64 : f32 to vector<32x1xf32>
    %122 = arith.divf %120, %121 : vector<32x1xf32>
    %123 = vector.broadcast %122 : vector<32x1xf32> to vector<32x8xf32>
    %124 = arith.subf %118, %123 : vector<32x8xf32>
    %125 = arith.mulf %124, %124 : vector<32x8xf32>
    %cst_65 = arith.constant dense<0.000000e+00> : vector<32xf32>
    %126 = vector.multi_reduction <add>, %125, %cst_65 [1] : vector<32x8xf32> to vector<32xf32>
    %127 = vector.shape_cast %126 : vector<32xf32> to vector<32x1xf32>
    %cst_66 = arith.constant 8.000000e+00 : f32
    %128 = vector.broadcast %cst_66 : f32 to vector<32x1xf32>
    %129 = arith.divf %127, %128 : vector<32x1xf32>
    %130 = vector.broadcast %122 : vector<32x1xf32> to vector<32x8xf32>
    %131 = arith.subf %118, %130 : vector<32x8xf32>
    %cst_67 = arith.constant 9.99999974E-6 : f32
    %132 = vector.broadcast %cst_67 : f32 to vector<32x1xf32>
    %133 = arith.addf %129, %132 : vector<32x1xf32>
    %134 = math.rsqrt %133 : vector<32x1xf32>
    %135 = vector.broadcast %134 : vector<32x1xf32> to vector<32x8xf32>
    %136 = arith.mulf %131, %135 : vector<32x8xf32>
    %137 = vector.broadcast %72 : vector<1x8xf32> to vector<32x8xf32>
    %138 = arith.mulf %136, %137 : vector<32x8xf32>
    %139 = vector.broadcast %73 : vector<1x8xf32> to vector<32x8xf32>
    %140 = arith.addf %138, %139 : vector<32x8xf32>
    %c0_68 = arith.constant 0 : index
    %c24_69 = arith.constant 24 : index
    %141 = vector.load %arg4[%c0_68, %c24_69] : memref<8x56xf32, #tpu.memory_space<vmem>>, vector<8x32xf32>
    %cst_70 = arith.constant dense<0.000000e+00> : vector<32x32xf32>
    %142 = tpu.matmul %140, %141, %cst_70 {dimension_numbers = #tpu.dot_dimension_numbers<[1], [0], [0], [1], [0, 0, 1, 1], [], []>} : vector<32x8xf32>, vector<8x32xf32>, vector<32x32xf32> -> vector<32x32xf32>
    %143 = vector.broadcast %70 : vector<1x32xf32> to vector<32x32xf32>
    %144 = arith.addf %142, %143 : vector<32x32xf32>
    %cst_71 = arith.constant 0.000000e+00 : f32
    %145 = vector.broadcast %cst_71 : f32 to vector<32x32xf32>
    %146 = arith.maximumf %144, %145 : vector<32x32xf32>
    %c0_72 = arith.constant 0 : index
    %c0_73 = arith.constant 0 : index
    %147 = vector.load %arg5[%c0_72, %c0_73] : memref<32x8xf32, #tpu.memory_space<vmem>>, vector<32x8xf32>
    %cst_74 = arith.constant dense<0.000000e+00> : vector<32x8xf32>
    %148 = tpu.matmul %146, %147, %cst_74 {dimension_numbers = #tpu.dot_dimension_numbers<[1], [0], [0], [1], [0, 0, 1, 1], [], []>} : vector<32x32xf32>, vector<32x8xf32>, vector<32x8xf32> -> vector<32x8xf32>
    %149 = vector.broadcast %71 : vector<1x8xf32> to vector<32x8xf32>
    %150 = arith.addf %148, %149 : vector<32x8xf32>
    %151 = arith.addf %140, %150 : vector<32x8xf32>
    %cst_75 = arith.constant dense<0.000000e+00> : vector<32xf32>
    %152 = vector.multi_reduction <add>, %151, %cst_75 [1] : vector<32x8xf32> to vector<32xf32>
    %153 = vector.shape_cast %152 : vector<32xf32> to vector<32x1xf32>
    %cst_76 = arith.constant 8.000000e+00 : f32
    %154 = vector.broadcast %cst_76 : f32 to vector<32x1xf32>
    %155 = arith.divf %153, %154 : vector<32x1xf32>
    %156 = vector.broadcast %155 : vector<32x1xf32> to vector<32x8xf32>
    %157 = arith.subf %151, %156 : vector<32x8xf32>
    %158 = arith.mulf %157, %157 : vector<32x8xf32>
    %cst_77 = arith.constant dense<0.000000e+00> : vector<32xf32>
    %159 = vector.multi_reduction <add>, %158, %cst_77 [1] : vector<32x8xf32> to vector<32xf32>
    %160 = vector.shape_cast %159 : vector<32xf32> to vector<32x1xf32>
    %cst_78 = arith.constant 8.000000e+00 : f32
    %161 = vector.broadcast %cst_78 : f32 to vector<32x1xf32>
    %162 = arith.divf %160, %161 : vector<32x1xf32>
    %163 = vector.broadcast %155 : vector<32x1xf32> to vector<32x8xf32>
    %164 = arith.subf %151, %163 : vector<32x8xf32>
    %cst_79 = arith.constant 9.99999974E-6 : f32
    %165 = vector.broadcast %cst_79 : f32 to vector<32x1xf32>
    %166 = arith.addf %162, %165 : vector<32x1xf32>
    %167 = math.rsqrt %166 : vector<32x1xf32>
    %168 = vector.broadcast %167 : vector<32x1xf32> to vector<32x8xf32>
    %169 = arith.mulf %164, %168 : vector<32x8xf32>
    %170 = vector.broadcast %74 : vector<1x8xf32> to vector<32x8xf32>
    %171 = arith.mulf %169, %170 : vector<32x8xf32>
    %172 = vector.broadcast %75 : vector<1x8xf32> to vector<32x8xf32>
    %173 = arith.addf %171, %172 : vector<32x8xf32>
    %174 = vector.shape_cast %173 : vector<32x8xf32> to vector<8x4x8xf32>
    %c0_80 = arith.constant 0 : index
    %c0_81 = arith.constant 0 : index
    %c0_82 = arith.constant 0 : index
    %175 = vector.load %arg8[%c0_80, %c0_81, %c0_82] : memref<8x4x8xf32, #tpu.memory_space<vmem>>, vector<8x4x8xf32>
    tpu.vector_store %arg8[%c0_80, %c0_81, %c0_82], %174 {strides = array<i32>} : memref<8x4x8xf32, #tpu.memory_space<vmem>>, vector<8x4x8xf32>,
    return
  }
  func.func @transform_0(%arg0: i32) -> (i32, i32, i32) {
    %c0_i32 = arith.constant 0 : i32
    %c0_i32_0 = arith.constant 0 : i32
    %c0_i32_1 = arith.constant 0 : i32
    return %arg0, %c0_i32, %c0_i32_0 : i32, i32, i32
  }
  func.func @transform_1(%arg0: i32) -> (i32, i32) {
    %c0_i32 = arith.constant 0 : i32
    %c0_i32_0 = arith.constant 0 : i32
    %c0_i32_1 = arith.constant 0 : i32
    return %c0_i32, %c0_i32_0 : i32, i32
  }
  func.func @transform_2(%arg0: i32) -> (i32, i32) {
    %c0_i32 = arith.constant 0 : i32
    %c0_i32_0 = arith.constant 0 : i32
    %c0_i32_1 = arith.constant 0 : i32
    return %c0_i32, %c0_i32_0 : i32, i32
  }
  func.func @transform_3(%arg0: i32) -> (i32, i32) {
    %c0_i32 = arith.constant 0 : i32
    %c0_i32_0 = arith.constant 0 : i32
    %c0_i32_1 = arith.constant 0 : i32
    return %c0_i32, %c0_i32_0 : i32, i32
  }
  func.func @transform_4(%arg0: i32) -> (i32, i32) {
    %c0_i32 = arith.constant 0 : i32
    %c0_i32_0 = arith.constant 0 : i32
    %c0_i32_1 = arith.constant 0 : i32
    return %c0_i32, %c0_i32_0 : i32, i32
  }
  func.func @transform_5(%arg0: i32) -> (i32, i32) {
    %c0_i32 = arith.constant 0 : i32
    %c0_i32_0 = arith.constant 0 : i32
    %c0_i32_1 = arith.constant 0 : i32
    return %c0_i32, %c0_i32_0 : i32, i32
  }
  func.func @transform_6(%arg0: i32) -> (i32, i32, i32, i32) {
    %c0_i32 = arith.constant 0 : i32
    %c0_i32_0 = arith.constant 0 : i32
    %c0_i32_1 = arith.constant 0 : i32
    %c0_i32_2 = arith.constant 0 : i32
    return %arg0, %c0_i32, %c0_i32_0, %c0_i32_1 : i32, i32, i32, i32
  }
  func.func @transform_7(%arg0: i32) -> (i32, i32, i32) {
    %c0_i32 = arith.constant 0 : i32
    %c0_i32_0 = arith.constant 0 : i32
    %c0_i32_1 = arith.constant 0 : i32
    return %arg0, %c0_i32, %c0_i32_0 : i32, i32, i32
  }
}

</mosaic_0001>

<bundles_post_ra>
// kernel: tpu_custom_call.1
= control target key start
LH: loop header
LB: loop body
LE: loop exit
PB: predicated region body
PF: predicated region fallthrough
CT: control target
= control target key end

     0   :  { %13 = vsyncpa [#allocation3], 0  ;;  %s6100_s0 = inlined_call_operand.vmem [shape: f32[8,4,8], index: 0, kind: input, shape index: {}]   ;;  %s6101_s1 = inlined_call_operand.vmem [shape: f32[8,16], index: 1, kind: input, shape index: {}]   ;;  %s6102_s2 = inlined_call_operand.vmem [shape: f32[1,16], index: 2, kind: input, shape index: {}]   ;;  %s6103_s3 = inlined_call_operand.hbm [shape: f32[8,56], index: 3, kind: input, shape index: {}]   ;;  %s6104_s4 = inlined_call_operand.vmem [shape: f32[32,8], index: 4, kind: input, shape index: {}]   ;;  %s6105_s5 = inlined_call_operand.vmem [shape: f32[1,96], index: 5, kind: input, shape index: {}]   ;;  %s6106_s6 = inlined_call_operand.vmem [shape: f32[8,2,4,4], index: 6, kind: output, shape index: {0}]   ;;  %s6107_s7 = inlined_call_operand.hbm [shape: f32[8,4,8], index: 7, kind: output, shape index: {1}]  }
   0x1   :  { %14 = vsyncpa [#allocation4], 0  ;;  %s5097_s24 = smov [#allocation2]   ;;  %s5049_s28 = scalar_lea.hbm %s6103_s3, 128 }
   0x2   :  { %s27_s25 = sshll.u32 %s5097_s24, 4  ;;  %p5050_p0 = scmp.ne.s32.totalorder %s6103_s3, %s5049_s28  ;;  %s28_s25 = int_to_ptr.vmem [resolvable:$true] %s27_s25 }
   0x3   :  { %p5053_p1 = scmp.lt.u32.totalorder %s5049_s28, %s6103_s3 }
   0x5   :  { %p5055_p2 = pnand %p5053_p1, %p5050_p0 }
   0x7   :  { %5058 = shalt.err (!%p5055_p2)
}
   0x8   :  { %s5059_s10 = scalar_lea.vmem %s28_s25, 128  ;;  %p5064_p4 = scmp.lt.s32.totalorder %s28_s25, %s28_s25 }
   0x9   :  { %p5060_p3 = scmp.ne.s32.totalorder %s28_s25, %s5059_s10  ;;  %p5065_p5 = scmp.lt.s32.totalorder %s5059_s10, %s5059_s10 }
   0xb   :  { %p5066_p6 = por %p5065_p5, %p5064_p4 }
   0xd   :  { %p5067_p7 = pnand %p5066_p6, %p5060_p3 }
   0xf   :  { %5070 = shalt.err (!%p5067_p7)
}
  0x10   :  { %30 = dma.hbm_to_vmem [thread:$0]  %s6103_s3, 128, %s28_s25, [#allocation3]  }
  0x11   :  { %5093 = dma.done.wait [#allocation3], 128  }
  0x12   :  { %5094 = vsyncadd [#allocation3], 4294967168  ;;  %v165_v0 = vld [vmem:[%s6101_s1] sm:$0xff]  ;;  %vm71_vm0 = vcmask 64512   ;;  %s5098_s19 = smov 120   ;;  %s5099_s26 = smov 116  }
  0x13   :  { %v38_v1 = vld [vmem:[%s6100_s0] sm:$0xf]  ;;  %v39_v2 = vld [vmem:[%s6100_s0 + $0x4] sm:$0xf]  ;;  %173 = vrot.lane.b32.xlu0 %v165_v0, %s5098_s19  ;;  %4628 = vmatprep.subr.mxu0 %v165_v0  ;;  %v40_v4 = vld [vmem:[%s6100_s0 + $0x8] sm:$0xf] }
  0x14   :  { %v5176_v3 = vcombine.low %v38_v1, %v39_v2  ;;  %v41_v5 = vld [vmem:[%s6100_s0 + $0xc] sm:$0xf]  ;;  %v42_v6 = vld [vmem:[%s6100_s0 + $0x10] sm:$0xf]  ;;  %4629 = vmatpush3.msra.mxu0 %v165_v0  ;;  %v43_v8 = vld [vmem:[%s6100_s0 + $0x14] sm:$0xf]  ;;  %1095 = vrot.lane.b32.xlu1 %v165_v0, %s5099_s26 }
  0x15   :  { %v5187_v7 = vcombine.low %v40_v4, %v41_v5  ;;  %v5196_v9 = vcombine.low %v42_v6, %v43_v8  ;;  %v44_v10 = vld [vmem:[%s6100_s0 + $0x18] sm:$0xf]  ;;  %v45_v11 = vld [vmem:[%s6100_s0 + $0x1c] sm:$0xf]  ;;  %v5207_v12 = vld [vmem:[%s6102_s2] ss:$0 sm:$0xff] }
  0x16   :  { %4638 = vmatprep.mubr.msk.f32.mxu1 %vm71_vm0, %v5176_v3  ;;  %4630 = vmatprep.mubr.msk.f32.mxu0 %vm71_vm0, %v5176_v3  ;;  %v5215_v13 = vcombine.low %v44_v10, %v45_v11  ;;  %s5100_s10 = smov 124   ;;  %v5101_v15 = vmov 0.0   ;;  %vm5102_vm1 = vmmov 0   ;;  %vm280_vm2 = vcmask 31744   ;;  %v5293_v43 = vld [vmem:[#allocation2] sm:$0xff]  ;;  %s5103_s2 = smov 112  }
  0x17   :  { %4631 = vmatmul.mubr.msk.f32.vlgmr.msra.gmra.mrb[0].mxu0 %vm71_vm0, %v5187_v7  ;;  %176 = vrot.lane.b32.xlu0 %v5207_v12, %s5098_s19  ;;  %vm3003_vm3 = vcmask 1043456   ;;  %vm891_vm5 = vcmask 27648   ;;  %s5104_s27 = smov 64   ;;  %s5108_s28 = smov 104   ;;  %vm3995_vm6 = vcmask 261120   ;;  %vm4373_vm7 = vcmask 60416  }
  0x18   :  { %4633 = vmatprep.mubr.msk.f32.mxu0 %vm71_vm0, %v5196_v9  ;;  %996 = vrot.lane.b32.xlu1 %v165_v0, %s5100_s10  ;;  %s5109_s29 = smov 72   ;;  %s5110_s11 = smov 48  }
  0x19   :  { %4644 = vmatprep.subr.mxu0 %v5101_v15 }
  0x1b   :  { %4634 = vmatmul.mubr.msk.f32.gmra.mrb[2].mxu0 %vm71_vm0, %v5215_v13  ;;  %1098 = vrot.lane.b32.xlu0 %v5207_v12, %s5099_s26 }
  0x1c   :  { %999 = vrot.lane.b32.xlu1 %v5207_v12, %s5100_s10  ;;  %4646 = vmatprep.mubr.msk.f32.mxu0 %vm5102_vm1, %v5101_v15 }
  0x1f   :  { %2105 = vrot.lane.b32.xlu0 %v5293_v43, %s5103_s2 }
  0x20   :  { %2002 = vrot.lane.b32.xlu1 %v5293_v43, %s5098_s19 }
  0x85   :  { %v174_v14 = vpop.permute.xlu0 %173 }
  0x86   :  { %4636 = vmatprep.subr.mxu1 %v174_v14  ;;  %v1096_v33 = vpop.permute.xlu1 %1095 }
  0x87   :  { %4637 = vmatpush3.msra.mxu1 %v174_v14 }
  0x88   :  { %4639 = vmatmul.mubr.msk.f32.vlgmr.msra.gmra.mrb[0].mxu1 %vm71_vm0, %v5187_v7  ;;  %4649 = vmatprep.subr.mxu1 %v5101_v15 }
  0x89   :  { %4641 = vmatprep.mubr.msk.f32.mxu1 %vm71_vm0, %v5196_v9  ;;  %v177_v20 = vpop.permute.xlu0 %176 }
  0x8a   :  { %v997_v39 = vpop.permute.xlu1 %996 }
  0x8c   :  { %4642 = vmatmul.mubr.msk.f32.gmra.mrb[2].mxu1 %vm71_vm0, %v5215_v13 }
  0x8d   :  { %4651 = vmatprep.mubr.msk.f32.mxu1 %vm5102_vm1, %v5101_v15  ;;  %v1099_v62 = vpop.permute.xlu0 %1098 }
  0x8e   :  { %v1000_v61 = vpop.permute.xlu1 %999 }
  0xea   :  { %v4632_v16 = vpop.f32.mrb[0].mxu0 }
  0xeb   :  { %v146_v17 = vpop.f32.mrb[1].mxu0  ;;  %v152_v30 = vadd.f32 %v4632_v16, %v5207_v12 }
  0xec   :  { %v147_v23 = vadd.f32 %v5207_v12, %v146_v17 }
  0xed   :  { %v269_v35 = vcombine.high %v152_v30, %v152_v30 }
  0xee   :  { %v4635_v18 = vpop.f32.mrb[2].mxu0  ;;  %v268_v28 = vcombine.high %v147_v23, %v147_v23 }
  0xef   :  { %v156_v19 = vpop.f32.mrb[3].mxu0  ;;  %v162_v40 = vadd.f32 %v4635_v18, %v5207_v12 }
  0xf0   :  { %v157_v34 = vadd.f32 %v5207_v12, %v156_v19 }
  0xf1   :  { %v271_v42 = vcombine.high %v162_v40, %v162_v40 }
  0xf2   :  { %v270_v38 = vcombine.high %v157_v34, %v157_v34 }
 0x15b   :  { %v4640_v21 = vpop.f32.mrb[0].mxu1 }
 0x15c   :  { %v245_v22 = vpop.f32.mrb[1].mxu1  ;;  %v251_v25 = vadd.f32 %v4640_v21, %v177_v20 }
 0x15d   :  { %v246_v24 = vadd.f32 %v245_v22, %v177_v20 }
 0x15e   :  { %v277_v31 = vcombine.high %v251_v25, %v251_v25 }
 0x15f   :  { %v276_v26 = vcombine.high %v246_v24, %v246_v24  ;;  %v4643_v27 = vpop.f32.mrb[2].mxu1  ;;  %4645 = vmatpush3.xpose.msk.msra.mxu0 %vm280_vm2, %v246_v24 }
 0x160   :  { %v255_v29 = vpop.f32.mrb[3].mxu1  ;;  %4654 = vmatprep.subr.mxu0 %v5101_v15  ;;  %v261_v36 = vadd.f32 %v4643_v27, %v177_v20  ;;  %v2106_v27 = vpop.permute.xlu0 %2105 }
 0x161   :  { %4650 = vmatpush3.xpose.msk.msra.mxu1 %vm280_vm2, %v276_v26  ;;  %v256_v32 = vadd.f32 %v255_v29, %v177_v20 }
 0x162   :  { %4647 = vmatmul.mubr.msk.f32.vlgmr.msra.gmra.mrb[4].mxu0 %vm280_vm2, %v147_v23  ;;  %4659 = vmatprep.subr.mxu1 %v5101_v15  ;;  %v279_v41 = vcombine.high %v261_v36, %v261_v36 }
 0x163   :  { %4655 = vmatpush3.xpose.msk.msra.mxu0 %vm280_vm2, %v251_v25  ;;  %4656 = vmatprep.mubr.msk.f32.mxu0 %vm5102_vm1, %v5101_v15  ;;  %v278_v37 = vcombine.high %v256_v32, %v256_v32 }
 0x164   :  { %4652 = vmatmul.mubr.msk.f32.vlgmr.msra.gmra.mrb[4].mxu1 %vm280_vm2, %v268_v28  ;;  %4664 = vmatprep.subr.mxu0 %v5101_v15  ;;  %v5362_v28 = vld [vmem:[%s6105_s5] ss:$0 sm:$0xff] }
 0x165   :  { %4660 = vmatpush3.xpose.msk.msra.mxu1 %vm280_vm2, %v277_v31  ;;  %4661 = vmatprep.mubr.msk.f32.mxu1 %vm5102_vm1, %v5101_v15 }
 0x166   :  { %4657 = vmatmul.mubr.msk.f32.vlgmr.msra.gmra.mrb[6].mxu0 %vm280_vm2, %v152_v30  ;;  %4669 = vmatprep.subr.mxu1 %v5101_v15 }
 0x167   :  { %4665 = vmatpush3.xpose.msk.msra.mxu0 %vm280_vm2, %v256_v32  ;;  %4666 = vmatprep.mubr.msk.f32.mxu0 %vm5102_vm1, %v5101_v15 }
 0x168   :  { %4662 = vmatmul.mubr.msk.f32.vlgmr.msra.gmra.mrb[6].mxu1 %vm280_vm2, %v269_v35  ;;  %4674 = vmatprep.subr.mxu0 %v5101_v15 }
 0x169   :  { %4670 = vmatpush3.xpose.msk.msra.mxu1 %vm280_vm2, %v278_v37  ;;  %4671 = vmatprep.mubr.msk.f32.mxu1 %vm5102_vm1, %v5101_v15 }
 0x16a   :  { %4667 = vmatmul.mubr.msk.f32.vlgmr.msra.gmra.mrb[8].mxu0 %vm280_vm2, %v157_v34  ;;  %4679 = vmatprep.subr.mxu1 %v5101_v15 }
 0x16b   :  { %4675 = vmatpush3.xpose.msk.msra.mxu0 %vm280_vm2, %v261_v36  ;;  %4676 = vmatprep.mubr.msk.f32.mxu0 %vm5102_vm1, %v5101_v15 }
 0x16c   :  { %4672 = vmatmul.mubr.msk.f32.vlgmr.msra.gmra.mrb[8].mxu1 %vm280_vm2, %v270_v38  ;;  %4684 = vmatprep.subr.mxu0 %v997_v39 }
 0x16d   :  { %4680 = vmatpush3.xpose.msk.msra.mxu1 %vm280_vm2, %v279_v41  ;;  %4681 = vmatprep.mubr.msk.f32.mxu1 %vm5102_vm1, %v5101_v15 }
 0x16e   :  { %4677 = vmatmul.mubr.msk.f32.vlgmr.msra.gmra.mrb[10].mxu0 %vm280_vm2, %v162_v40  ;;  %4692 = vmatprep.subr.mxu1 %v1096_v33 }
 0x16f   :  { %4685 = vmatpush3.msra.mxu0 %v997_v39  ;;  %4686 = vmatprep.mubr.msk.f32.mxu0 %vm71_vm0, %v5176_v3 }
 0x170   :  { %4682 = vmatmul.mubr.msk.f32.vlgmr.msra.gmra.mrb[10].mxu1 %vm280_vm2, %v271_v42  ;;  %4700 = vmatprep.subr.mxu0 %v5101_v15 }
 0x171   :  { %4693 = vmatpush3.msra.mxu1 %v1096_v33  ;;  %4694 = vmatprep.mubr.msk.f32.mxu1 %vm71_vm0, %v5176_v3 }
 0x172   :  { %4687 = vmatmul.mubr.msk.f32.vlgmr.msra.gmra.mrb[12].mxu0 %vm71_vm0, %v5187_v7  ;;  %4705 = vmatprep.subr.mxu1 %v5101_v15 }
 0x173   :  { %4689 = vmatprep.mubr.msk.f32.mxu0 %vm71_vm0, %v5196_v9  ;;  %2005 = vrot.lane.b32.xlu1 %v5362_v28, %s5098_s19 }
 0x174   :  { %4695 = vmatmul.mubr.msk.f32.vlgmr.msra.gmra.mrb[12].mxu1 %vm71_vm0, %v5187_v7  ;;  %2108 = vrot.lane.b32.xlu0 %v5362_v28, %s5103_s2 }
 0x175   :  { %4697 = vmatprep.mubr.msk.f32.mxu1 %vm71_vm0, %v5196_v9 }
 0x176   :  { %4690 = vmatmul.mubr.msk.f32.gmra.mrb[14].mxu0 %vm71_vm0, %v5215_v13 }
 0x177   :  { %4702 = vmatprep.mubr.msk.f32.mxu0 %vm5102_vm1, %v5101_v15 }
 0x178   :  { %4698 = vmatmul.mubr.msk.f32.gmra.mrb[14].mxu1 %vm71_vm0, %v5215_v13 }
 0x179   :  { %4707 = vmatprep.mubr.msk.f32.mxu1 %vm5102_vm1, %v5101_v15 }
 0x235   :  { %v5299_v44 = vpop.f32.mrb[4].mxu0 }
 0x236   :  { %v4648_v45 = vpop.f32.mrb[5].mxu0 }
 0x237   :  { %v5301_v46 = vpop.f32.mrb[4].mxu1 }
 0x238   :  { %v4653_v47 = vpop.f32.mrb[5].mxu1 }
 0x239   :  { %v5303_v48 = vpop.f32.mrb[6].mxu0 }
 0x23a   :  { %v4658_v49 = vpop.f32.mrb[7].mxu0 }
 0x23b   :  { %v5305_v50 = vpop.f32.mrb[6].mxu1 }
 0x23c   :  { %v4663_v51 = vpop.f32.mrb[7].mxu1 }
 0x23d   :  { %v5307_v52 = vpop.f32.mrb[8].mxu0 }
 0x23e   :  { %v4668_v53 = vpop.f32.mrb[9].mxu0 }
 0x23f   :  { %v5309_v54 = vpop.f32.mrb[8].mxu1 }
 0x240   :  { %v4673_v55 = vpop.f32.mrb[9].mxu1 }
 0x241   :  { %v5311_v56 = vpop.f32.mrb[10].mxu0 }
 0x242   :  { %v4678_v57 = vpop.f32.mrb[11].mxu0 }
 0x243   :  { %v5313_v58 = vpop.f32.mrb[10].mxu1  ;;  %v2109_v57 = vpop.permute.xlu0 %2108 }
 0x244   :  { %v4683_v59 = vpop.f32.mrb[11].mxu1 }
 0x245   :  { %v4688_v60 = vpop.f32.mrb[12].mxu0 }
 0x246   :  { %v1068_v63 = vpop.f32.mrb[13].mxu0  ;;  %v1074_v16 = vadd.f32 %v4688_v60, %v1000_v61 }
 0x247   :  { %v4696_v0 = vpop.f32.mrb[12].mxu1  ;;  %v1069_v2 = vadd.f32 %v1068_v63, %v1000_v61 }
 0x248   :  { %v1167_v1 = vpop.f32.mrb[13].mxu1  ;;  %v1173_v8 = vadd.f32 %v4696_v0, %v1099_v62  ;;  %v1191_v19 = vcombine.high %v1074_v16, %v1074_v16 }
 0x249   :  { %v1168_v4 = vadd.f32 %v1167_v1, %v1099_v62  ;;  %v4691_v5 = vpop.f32.mrb[14].mxu0  ;;  %v1190_v12 = vcombine.high %v1069_v2, %v1069_v2 }
 0x24a   :  { %v1078_v6 = vpop.f32.mrb[15].mxu0  ;;  %v1199_v17 = vcombine.high %v1173_v8, %v1173_v8  ;;  %v1084_v23 = vadd.f32 %v4691_v5, %v1000_v61 }
 0x24b   :  { %v1198_v10 = vcombine.high %v1168_v4, %v1168_v4  ;;  %v4699_v11 = vpop.f32.mrb[14].mxu1  ;;  %4701 = vmatpush3.xpose.msk.msra.mxu0 %vm280_vm2, %v1168_v4  ;;  %v1079_v20 = vadd.f32 %v1078_v6, %v1000_v61 }
 0x24c   :  { %v1177_v14 = vpop.f32.mrb[15].mxu1  ;;  %4710 = vmatprep.subr.mxu0 %v5101_v15  ;;  %v1183_v21 = vadd.f32 %v4699_v11, %v1099_v62  ;;  %v1193_v26 = vcombine.high %v1084_v23, %v1084_v23 }
 0x24d   :  { %4706 = vmatpush3.xpose.msk.msra.mxu1 %vm280_vm2, %v1198_v10  ;;  %v1178_v18 = vadd.f32 %v1177_v14, %v1099_v62  ;;  %v1192_v24 = vcombine.high %v1079_v20, %v1079_v20 }
 0x24e   :  { %4703 = vmatmul.mubr.msk.f32.vlgmr.msra.gmra.mrb[16].mxu0 %vm280_vm2, %v1069_v2  ;;  %4715 = vmatprep.subr.mxu1 %v5101_v15  ;;  %v1201_v25 = vcombine.high %v1183_v21, %v1183_v21 }
 0x24f   :  { %4711 = vmatpush3.xpose.msk.msra.mxu0 %vm280_vm2, %v1173_v8  ;;  %4712 = vmatprep.mubr.msk.f32.mxu0 %vm5102_vm1, %v5101_v15  ;;  %v1200_v22 = vcombine.high %v1178_v18, %v1178_v18 }
 0x250   :  { %4708 = vmatmul.mubr.msk.f32.vlgmr.msra.gmra.mrb[16].mxu1 %vm280_vm2, %v1190_v12  ;;  %4720 = vmatprep.subr.mxu0 %v5101_v15 }
 0x251   :  { %4716 = vmatpush3.xpose.msk.msra.mxu1 %vm280_vm2, %v1199_v17  ;;  %4717 = vmatprep.mubr.msk.f32.mxu1 %vm5102_vm1, %v5101_v15 }
 0x252   :  { %4713 = vmatmul.mubr.msk.f32.vlgmr.msra.gmra.mrb[18].mxu0 %vm280_vm2, %v1074_v16  ;;  %4725 = vmatprep.subr.mxu1 %v5101_v15 }
 0x253   :  { %4721 = vmatpush3.xpose.msk.msra.mxu0 %vm280_vm2, %v1178_v18  ;;  %4722 = vmatprep.mubr.msk.f32.mxu0 %vm5102_vm1, %v5101_v15 }
 0x254   :  { %4718 = vmatmul.mubr.msk.f32.vlgmr.msra.gmra.mrb[18].mxu1 %vm280_vm2, %v1191_v19  ;;  %4730 = vmatprep.subr.mxu0 %v5101_v15 }
 0x255   :  { %4726 = vmatpush3.xpose.msk.msra.mxu1 %vm280_vm2, %v1200_v22  ;;  %4727 = vmatprep.mubr.msk.f32.mxu1 %vm5102_vm1, %v5101_v15 }
 0x256   :  { %4723 = vmatmul.mubr.msk.f32.vlgmr.msra.gmra.mrb[20].mxu0 %vm280_vm2, %v1079_v20  ;;  %4735 = vmatprep.subr.mxu1 %v5101_v15 }
 0x257   :  { %4731 = vmatpush3.xpose.msk.msra.mxu0 %vm280_vm2, %v1183_v21  ;;  %4732 = vmatprep.mubr.msk.f32.mxu0 %vm5102_vm1, %v5101_v15 }
 0x258   :  { %4728 = vmatmul.mubr.msk.f32.vlgmr.msra.gmra.mrb[20].mxu1 %vm280_vm2, %v1192_v24  ;;  %4740 = vmatprep.subr.mxu0 %v5293_v43 }
 0x259   :  { %4736 = vmatpush3.xpose.msk.msra.mxu1 %vm280_vm2, %v1201_v25  ;;  %4737 = vmatprep.mubr.msk.f32.mxu1 %vm5102_vm1, %v5101_v15 }
 0x25a   :  { %4733 = vmatmul.mubr.msk.f32.vlgmr.msra.gmra.mrb[22].mxu0 %vm280_vm2, %v1084_v23 }
 0x25b   :  { %4741 = vmatpush3.msra.mxu0 %v5293_v43  ;;  %4742 = vmatprep.mubr.msk.f32.mxu0 %vm71_vm0, %v5176_v3  ;;  %v2003_v3 = vpop.permute.xlu1 %2002 }
 0x25c   :  { %4738 = vmatmul.mubr.msk.f32.vlgmr.msra.gmra.mrb[22].mxu1 %vm280_vm2, %v1193_v26  ;;  %4756 = vmatprep.subr.mxu0 %v2106_v27  ;;  %v46_v26 = vlaneseq }
 0x25d   :  { %4748 = vmatprep.subr.mxu1 %v2003_v3 }
 0x25e   :  { %4743 = vmatmul.mubr.msk.f32.vlgmr.msra.gmra.mrb[24].mxu0 %vm71_vm0, %v5187_v7  ;;  %4749 = vmatpush3.msra.mxu1 %v2003_v3  ;;  %v49_v3 = vand.u32 127, %v46_v26 }
 0x25f   :  { %4745 = vmatprep.mubr.msk.f32.mxu0 %vm71_vm0, %v5196_v9  ;;  %4757 = vmatpush3.msra.mxu0 %v2106_v27  ;;  %v2006_v59 = vpop.permute.xlu1 %2005  ;;  %v5465_v27 = vshrl.u32 %v46_v26, 7 }
 0x260   :  { %4774 = vmatprep.subr.mxu0 %v5101_v15  ;;  %4764 = vmatprep.subr.mxu1 %v5101_v15 }
 0x261   :  { %vm5468_vm4 = vcmp.gt.s32.totalorder %v49_v3, %v5465_v27 }
 0x262   :  { %4746 = vmatmul.mubr.msk.f32.gmra.mrb[26].mxu0 %vm71_vm0, %v5215_v13 }
 0x321   :  { %v5370_v7 = vpop.f32.mrb[16].mxu0 }
 0x322   :  { %v4704_v9 = vpop.f32.mrb[17].mxu0 }
 0x323   :  { %v5372_v13 = vpop.f32.mrb[16].mxu1 }
 0x324   :  { %v4709_v29 = vpop.f32.mrb[17].mxu1 }
 0x325   :  { %v5374_v30 = vpop.f32.mrb[18].mxu0 }
 0x326   :  { %v4714_v31 = vpop.f32.mrb[19].mxu0 }
 0x327   :  { %v5376_v32 = vpop.f32.mrb[18].mxu1 }
 0x328   :  { %v4719_v33 = vpop.f32.mrb[19].mxu1 }
 0x329   :  { %v5378_v34 = vpop.f32.mrb[20].mxu0 }
 0x32a   :  { %v4724_v35 = vpop.f32.mrb[21].mxu0 }
 0x32b   :  { %v5380_v36 = vpop.f32.mrb[20].mxu1 }
 0x32c   :  { %v4729_v37 = vpop.f32.mrb[21].mxu1 }
 0x32d   :  { %v5382_v38 = vpop.f32.mrb[22].mxu0 }
 0x32e   :  { %v4734_v39 = vpop.f32.mrb[23].mxu0 }
 0x32f   :  { %v5384_v40 = vpop.f32.mrb[22].mxu1 }
 0x330   :  { %v4739_v41 = vpop.f32.mrb[23].mxu1 }
 0x331   :  { %v4744_v42 = vpop.f32.mrb[24].mxu0 }
 0x332   :  { %v1981_v43 = vpop.f32.mrb[25].mxu0  ;;  %v5390_v47 = vadd.f32 %v4744_v42, %v5362_v28 }
 0x333   :  { %v5387_v45 = vadd.f32 %v5362_v28, %v1981_v43 }
 0x335   :  { %v4747_v49 = vpop.f32.mrb[26].mxu0  ;;  %4750 = vmatprep.mubr.msk.f32.mxu1 %vm71_vm0, %v5387_v45  ;;  %4758 = vmatprep.mubr.msk.f32.mxu0 %vm71_vm0, %v5387_v45  ;;  %v2996_v25 = vcombine.high %v5387_v45, %v5387_v45 }
 0x336   :  { %v5397_v51 = vadd.f32 %v4747_v49, %v5362_v28  ;;  %v1991_v53 = vpop.f32.mrb[27].mxu0  ;;  %4751 = vmatmul.mubr.msk.f32.vlgmr.msra.gmra.mrb[24].mxu1 %vm71_vm0, %v5390_v47  ;;  %4759 = vmatmul.mubr.msk.f32.vlgmr.msra.gmra.mrb[28].mxu0 %vm71_vm0, %v5390_v47 }
 0x337   :  { %v5404_v55 = vadd.f32 %v5362_v28, %v1991_v53 }
 0x339   :  { %4761 = vmatprep.mubr.msk.f32.mxu0 %vm71_vm0, %v5404_v55  ;;  %4753 = vmatprep.mubr.msk.f32.mxu1 %vm71_vm0, %v5404_v55 }
 0x33a   :  { %4762 = vmatmul.mubr.msk.f32.gmra.mrb[30].mxu0 %vm71_vm0, %v5397_v51  ;;  %4754 = vmatmul.mubr.msk.f32.gmra.mrb[26].mxu1 %vm71_vm0, %v5397_v51 }
 0x33b   :  { %4776 = vmatprep.mubr.msk.f32.mxu0 %vm5102_vm1, %v5101_v15  ;;  %4766 = vmatprep.mubr.msk.f32.mxu1 %vm5102_vm1, %v5101_v15 }
 0x409   :  { %v4752_v60 = vpop.f32.mrb[24].mxu1  ;;  %v4760_v61 = vpop.f32.mrb[28].mxu0 }
 0x40a   :  { %v2183_v62 = vadd.f32 %v4760_v61, %v2109_v57  ;;  %v2086_v63 = vpop.f32.mrb[25].mxu1  ;;  %v2177_v0 = vpop.f32.mrb[29].mxu0  ;;  %v2092_v2 = vadd.f32 %v4752_v60, %v2006_v59 }
 0x40b   :  { %v2178_v1 = vadd.f32 %v2177_v0, %v2109_v57  ;;  %v2087_v6 = vadd.f32 %v2086_v63, %v2006_v59 }
 0x40c   :  { %4775 = vmatpush3.xpose.msk.msra.mxu0 %vm71_vm0, %v2183_v62  ;;  %v2209_v17 = vcombine.high %v2183_v62, %v2183_v62  ;;  %v2201_v19 = vcombine.high %v2092_v2, %v2092_v2 }
 0x40d   :  { %v4763_v4 = vpop.f32.mrb[30].mxu0  ;;  %4765 = vmatpush3.xpose.msk.msra.mxu1 %vm71_vm0, %v2178_v1  ;;  %v4755_v5 = vpop.f32.mrb[26].mxu1  ;;  %4784 = vmatprep.subr.mxu0 %v5101_v15  ;;  %v2208_v11 = vcombine.high %v2178_v1, %v2178_v1  ;;  %v2200_v14 = vcombine.high %v2087_v6, %v2087_v6 }
 0x40e   :  { %v2187_v8 = vpop.f32.mrb[31].mxu0  ;;  %4769 = vmatprep.subr.mxu1 %v5101_v15  ;;  %v2096_v10 = vpop.f32.mrb[27].mxu1  ;;  %v2193_v18 = vadd.f32 %v4763_v4, %v2109_v57  ;;  %v2102_v20 = vadd.f32 %v4755_v5, %v2006_v59 }
 0x40f   :  { %v2188_v12 = vadd.f32 %v2187_v8, %v2109_v57  ;;  %4777 = vmatmul.mubr.msk.f32.vlgmr.msra.gmra.mrb[32].mxu0 %vm71_vm0, %v2092_v2  ;;  %v2097_v16 = vadd.f32 %v2096_v10, %v2006_v59 }
 0x410   :  { %4767 = vmatmul.mubr.msk.f32.vlgmr.msra.gmra.mrb[28].mxu1 %vm71_vm0, %v2087_v6  ;;  %4786 = vmatprep.mubr.msk.f32.mxu0 %vm5102_vm1, %v5101_v15  ;;  %v2211_v23 = vcombine.high %v2193_v18, %v2193_v18  ;;  %v2203_v24 = vcombine.high %v2102_v20, %v2102_v20 }
 0x411   :  { %4770 = vmatpush3.xpose.msk.msra.mxu1 %vm71_vm0, %v2208_v11  ;;  %4785 = vmatpush3.xpose.msk.msra.mxu0 %vm71_vm0, %v2188_v12  ;;  %v2210_v21 = vcombine.high %v2188_v12, %v2188_v12  ;;  %v2202_v22 = vcombine.high %v2097_v16, %v2097_v16 }
 0x412   :  { %4771 = vmatprep.mubr.msk.f32.mxu1 %vm5102_vm1, %v5101_v15  ;;  %4779 = vmatprep.subr.mxu1 %v5101_v15 }
 0x413   :  { %4794 = vmatprep.subr.mxu0 %v5101_v15 }
 0x414   :  { %4772 = vmatmul.mubr.msk.f32.vlgmr.msra.gmra.mrb[30].mxu1 %vm71_vm0, %v2200_v14  ;;  %4787 = vmatmul.mubr.msk.f32.vlgmr.msra.gmra.mrb[34].mxu0 %vm71_vm0, %v2097_v16 }
 0x415   :  { %4780 = vmatpush3.xpose.msk.msra.mxu1 %vm71_vm0, %v2209_v17  ;;  %4795 = vmatpush3.xpose.msk.msra.mxu0 %vm71_vm0, %v2193_v18 }
 0x416   :  { %4781 = vmatprep.mubr.msk.f32.mxu1 %vm5102_vm1, %v5101_v15  ;;  %4796 = vmatprep.mubr.msk.f32.mxu0 %vm5102_vm1, %v5101_v15 }
 0x417   :  { %4789 = vmatprep.subr.mxu1 %v5101_v15  ;;  %4804 = vmatprep.subr.mxu0 %v5101_v15 }
 0x418   :  { %4782 = vmatmul.mubr.msk.f32.vlgmr.msra.gmra.mrb[32].mxu1 %vm71_vm0, %v2201_v19  ;;  %4797 = vmatmul.mubr.msk.f32.vlgmr.msra.gmra.mrb[36].mxu0 %vm71_vm0, %v2102_v20 }
 0x419   :  { %4790 = vmatpush3.xpose.msk.msra.mxu1 %vm71_vm0, %v2210_v21  ;;  %4805 = vmatpush3.msk.msra.mxu0 %vm3003_vm3, %v5387_v45 }
 0x41a   :  { %4791 = vmatprep.mubr.msk.f32.mxu1 %vm5102_vm1, %v5101_v15  ;;  %4799 = vmatprep.subr.mxu1 %v5101_v15 }
 0x41b   :  { %4806 = vmatprep.mubr.msk.f32.mxu0 %vm5102_vm1, %v5101_v15  ;;  %4814 = vmatprep.subr.mxu0 %v5101_v15 }
 0x41c   :  { %4792 = vmatmul.mubr.msk.f32.vlgmr.msra.gmra.mrb[34].mxu1 %vm71_vm0, %v2202_v22 }
 0x41d   :  { %4800 = vmatpush3.xpose.msk.msra.mxu1 %vm71_vm0, %v2211_v23  ;;  %4801 = vmatprep.mubr.msk.f32.mxu1 %vm5102_vm1, %v5101_v15 }
 0x41e   :  { %4809 = vmatprep.subr.mxu1 %v5101_v15 }
 0x420   :  { %4802 = vmatmul.mubr.msk.f32.vlgmr.msra.gmra.mrb[36].mxu1 %vm71_vm0, %v2203_v24 }
 0x421   :  { %4810 = vmatpush3.msk.msra.mxu1 %vm3003_vm3, %v2996_v25  ;;  %4811 = vmatprep.mubr.msk.f32.mxu1 %vm5102_vm1, %v5101_v15 }
 0x422   :  { %4819 = vmatprep.subr.mxu1 %v5101_v15 }
 0x4e2   :  { %v2430_v9 = vpop.f32.mrb[32].mxu0 }
 0x4e3   :  { %v2806_v29 = vmul.f32 0.35355338, %v2430_v9  ;;  %v2282_v31 = vpop.f32.mrb[28].mxu1  ;;  %v4778_v33 = vpop.f32.mrb[33].mxu0 }
 0x4e4   :  { %v2804_v35 = vmul.f32 0.35355338, %v2282_v31  ;;  %v4768_v37 = vpop.f32.mrb[29].mxu1 }
 0x4e5   :  { %v2814_v49 = vsel %vm5468_vm4, -inf, %v2806_v29 }
 0x4e6   :  { %v2812_v41 = vsel %vm5468_vm4, -inf, %v2804_v35  ;;  %v2826_v0 = vsel %vm891_vm5, %v2814_v49, -inf }
 0x4e7   :  { %v2356_v42 = vpop.f32.mrb[30].mxu1  ;;  %v2578_v43 = vpop.f32.mrb[34].mxu0  ;;  %v2820_v45 = vsel %vm891_vm5, %v2812_v41, -inf }
 0x4e8   :  { %v2805_v53 = vmul.f32 0.35355338, %v2356_v42  ;;  %v2808_v57 = vmul.f32 0.35355338, %v2578_v43  ;;  %v4788_v59 = vpop.f32.mrb[35].mxu0  ;;  %2821 = vmax.xlane.f32.xlu0 %v2820_v45  ;;  %v4773_v60 = vpop.f32.mrb[31].mxu1 }
 0x4ea   :  { %v2813_v61 = vsel %vm5468_vm4, -inf, %v2805_v53  ;;  %v2816_v2 = vsel %vm5468_vm4, -inf, %v2808_v57 }
 0x4eb   :  { %v2504_v62 = vpop.f32.mrb[32].mxu1  ;;  %v2726_v63 = vpop.f32.mrb[36].mxu0  ;;  %v2823_v1 = vsel %vm891_vm5, %v2813_v61, -inf  ;;  %v2832_v12 = vsel %vm891_vm5, %v2816_v2, -inf }
 0x4ec   :  { %v2807_v4 = vmul.f32 0.35355338, %v2504_v62  ;;  %v2810_v5 = vmul.f32 0.35355338, %v2726_v63  ;;  %v4798_v6 = vpop.f32.mrb[37].mxu0  ;;  %2827 = vmax.xlane.f32.xlu0 %v2826_v0  ;;  %2824 = vmax.xlane.f32.xlu1 %v2823_v1  ;;  %v4783_v8 = vpop.f32.mrb[33].mxu1 }
 0x4ee   :  { %v2815_v10 = vsel %vm5468_vm4, -inf, %v2807_v4  ;;  %v2818_v18 = vsel %vm5468_vm4, -inf, %v2810_v5 }
 0x4ef   :  { %v2652_v11 = vpop.f32.mrb[34].mxu1  ;;  %v2829_v14 = vsel %vm891_vm5, %v2815_v10, -inf  ;;  %v2838_v21 = vsel %vm891_vm5, %v2818_v18, -inf }
 0x4f0   :  { %v2809_v16 = vmul.f32 0.35355338, %v2652_v11  ;;  %2833 = vmax.xlane.f32.xlu1 %v2832_v12  ;;  %2830 = vmax.xlane.f32.xlu0 %v2829_v14  ;;  %v4793_v17 = vpop.f32.mrb[35].mxu1 }
 0x4f2   :  { %v2817_v19 = vsel %vm5468_vm4, -inf, %v2809_v16 }
 0x4f3   :  { %v2800_v20 = vpop.f32.mrb[36].mxu1  ;;  %v2835_v22 = vsel %vm891_vm5, %v2817_v19, -inf }
 0x4f4   :  { %v2811_v23 = vmul.f32 0.35355338, %v2800_v20  ;;  %2839 = vmax.xlane.f32.xlu1 %v2838_v21  ;;  %2836 = vmax.xlane.f32.xlu0 %v2835_v22  ;;  %v4803_v24 = vpop.f32.mrb[37].mxu1 }
 0x4f6   :  { %v2819_v25 = vsel %vm5468_vm4, -inf, %v2811_v23 }
 0x4f7   :  { %v2841_v26 = vsel %vm891_vm5, %v2819_v25, -inf }
 0x4f8   :  { %2842 = vmax.xlane.f32.xlu0 %v2841_v26 }
 0x575   :  { %v2822_v3 = vpop.xlane.xlu0 %2821 }
 0x576   :  { %v2844_v9 = vsub.f32 %v2812_v41, %v2822_v3 }
 0x578   :  { %v2852_v29 = vmul.f32 1.442695, %v2844_v9 }
 0x579   :  { %v2828_v31 = vpop.xlane.xlu0 %2827  ;;  %v2825_v33 = vpop.xlane.xlu1 %2824 }
 0x57a   :  { %4895 = vpow2.f32 %v2852_v29  ;;  %v2846_v35 = vsub.f32 %v2814_v49, %v2828_v31  ;;  %v2845_v37 = vsub.f32 %v2813_v61, %v2825_v33 }
 0x57c   :  { %v2856_v42 = vmul.f32 1.442695, %v2846_v35  ;;  %v2854_v43 = vmul.f32 1.442695, %v2845_v37 }
 0x57d   :  { %v2834_v45 = vpop.xlane.xlu1 %2833  ;;  %v2831_v53 = vpop.xlane.xlu0 %2830 }
 0x57e   :  { %4897 = vpow2.f32 %v2856_v42  ;;  %v2848_v57 = vsub.f32 %v2816_v2, %v2834_v45  ;;  %v2847_v59 = vsub.f32 %v2815_v10, %v2831_v53 }
 0x57f   :  { %4899 = vpow2.f32 %v2854_v43 }
 0x580   :  { %v2860_v60 = vmul.f32 1.442695, %v2848_v57  ;;  %v2858_v62 = vmul.f32 1.442695, %v2847_v59 }
 0x581   :  { %v2840_v63 = vpop.xlane.xlu1 %2839  ;;  %v2837_v0 = vpop.xlane.xlu0 %2836 }
 0x582   :  { %4901 = vpow2.f32 %v2860_v60  ;;  %v2850_v41 = vsub.f32 %v2818_v18, %v2840_v63  ;;  %v2849_v1 = vsub.f32 %v2817_v19, %v2837_v0 }
 0x583   :  { %4903 = vpow2.f32 %v2858_v62 }
 0x584   :  { %v4896_v4 = vpop.eup %4895  ;;  %v2864_v5 = vmul.f32 1.442695, %v2850_v41  ;;  %v2862_v49 = vmul.f32 1.442695, %v2849_v1 }
 0x585   :  { %v2843_v61 = vpop.xlane.xlu0 %2842  ;;  %v2868_v6 = vsel %vm891_vm5, %v4896_v4, 0.0 }
 0x586   :  { %4905 = vpow2.f32 %v2864_v5  ;;  %v2851_v8 = vsub.f32 %v2819_v25, %v2843_v61  ;;  %2869 = vadd.xlane.f32.xlu1 %v2868_v6 }
 0x587   :  { %4907 = vpow2.f32 %v2862_v49 }
 0x588   :  { %v4898_v2 = vpop.eup %4897  ;;  %v2866_v10 = vmul.f32 1.442695, %v2851_v8 }
 0x589   :  { %v4900_v11 = vpop.eup %4899  ;;  %v2874_v12 = vsel %vm891_vm5, %v4898_v2, 0.0 }
 0x58a   :  { %4909 = vpow2.f32 %v2866_v10  ;;  %2875 = vadd.xlane.f32.xlu1 %v2874_v12  ;;  %v2871_v14 = vsel %vm891_vm5, %v4900_v11, 0.0 }
 0x58b   :  { %2872 = vadd.xlane.f32.xlu0 %v2871_v14 }
 0x58c   :  { %v4902_v16 = vpop.eup %4901 }
 0x58d   :  { %v4904_v17 = vpop.eup %4903  ;;  %v2880_v18 = vsel %vm891_vm5, %v4902_v16, 0.0 }
 0x58e   :  { %2881 = vadd.xlane.f32.xlu1 %v2880_v18  ;;  %v2877_v19 = vsel %vm891_vm5, %v4904_v17, 0.0 }
 0x58f   :  { %2878 = vadd.xlane.f32.xlu0 %v2877_v19 }
 0x590   :  { %v4906_v20 = vpop.eup %4905 }
 0x591   :  { %v4908_v21 = vpop.eup %4907  ;;  %v2886_v22 = vsel %vm891_vm5, %v4906_v20, 0.0 }
 0x592   :  { %2887 = vadd.xlane.f32.xlu1 %v2886_v22  ;;  %v2883_v23 = vsel %vm891_vm5, %v4908_v21, 0.0 }
 0x593   :  { %2884 = vadd.xlane.f32.xlu0 %v2883_v23 }
 0x594   :  { %v4910_v24 = vpop.eup %4909 }
 0x595   :  { %v2889_v25 = vsel %vm891_vm5, %v4910_v24, 0.0 }
 0x597   :  { %2890 = vadd.xlane.f32.xlu0 %v2889_v25 }
 0x613   :  { %v2870_v26 = vpop.xlane.xlu1 %2869 }
 0x614   :  { %4911 = vrcp.f32 %v2870_v26 }
 0x617   :  { %v2876_v3 = vpop.xlane.xlu1 %2875 }
 0x618   :  { %4913 = vrcp.f32 %v2876_v3  ;;  %v2873_v9 = vpop.xlane.xlu0 %2872 }
 0x619   :  { %4915 = vrcp.f32 %v2873_v9 }
 0x61b   :  { %v2882_v29 = vpop.xlane.xlu1 %2881 }
 0x61c   :  { %4917 = vrcp.f32 %v2882_v29  ;;  %v2879_v31 = vpop.xlane.xlu0 %2878 }
 0x61d   :  { %4919 = vrcp.f32 %v2879_v31 }
 0x61e   :  { %v4912_v33 = vpop.eup %4911 }
 0x61f   :  { %v2888_v35 = vpop.xlane.xlu1 %2887  ;;  %v2893_v37 = vmul.f32 %v4912_v33, %v4896_v4 }
 0x620   :  { %4921 = vrcp.f32 %v2888_v35  ;;  %v2885_v42 = vpop.xlane.xlu0 %2884 }
 0x621   :  { %4923 = vrcp.f32 %v2885_v42  ;;  %v2908_v43 = vsel %vm891_vm5, %v2893_v37, -inf }
 0x622   :  { %v4914_v45 = vpop.eup %4913  ;;  %2909 = vmax.xlane.f32.xlu1 %v2908_v43 }
 0x623   :  { %v4916_v53 = vpop.eup %4915  ;;  %v2897_v57 = vmul.f32 %v4914_v45, %v4898_v2 }
 0x624   :  { %v2891_v59 = vpop.xlane.xlu0 %2890  ;;  %v2895_v60 = vmul.f32 %v4916_v53, %v4900_v11 }
 0x625   :  { %4925 = vrcp.f32 %v2891_v59  ;;  %v2914_v62 = vsel %vm891_vm5, %v2897_v57, -inf }
 0x626   :  { %v4918_v63 = vpop.eup %4917  ;;  %2915 = vmax.xlane.f32.xlu1 %v2914_v62  ;;  %v2911_v0 = vsel %vm891_vm5, %v2895_v60, -inf }
 0x627   :  { %v4920_v41 = vpop.eup %4919  ;;  %2912 = vmax.xlane.f32.xlu0 %v2911_v0  ;;  %v2901_v1 = vmul.f32 %v4918_v63, %v4902_v16 }
 0x628   :  { %v2899_v4 = vmul.f32 %v4920_v41, %v4904_v17 }
 0x629   :  { %v2920_v5 = vsel %vm891_vm5, %v2901_v1, -inf }
 0x62a   :  { %v4922_v49 = vpop.eup %4921  ;;  %2921 = vmax.xlane.f32.xlu1 %v2920_v5  ;;  %v2917_v61 = vsel %vm891_vm5, %v2899_v4, -inf }
 0x62b   :  { %v4924_v6 = vpop.eup %4923  ;;  %2918 = vmax.xlane.f32.xlu0 %v2917_v61  ;;  %v2905_v8 = vmul.f32 %v4922_v49, %v4906_v20 }
 0x62c   :  { %v2903_v2 = vmul.f32 %v4924_v6, %v4908_v21 }
 0x62d   :  { %v2926_v10 = vsel %vm891_vm5, %v2905_v8, -inf }
 0x62e   :  { %2927 = vmax.xlane.f32.xlu1 %v2926_v10  ;;  %v2923_v11 = vsel %vm891_vm5, %v2903_v2, -inf }
 0x62f   :  { %v4926_v12 = vpop.eup %4925  ;;  %2924 = vmax.xlane.f32.xlu0 %v2923_v11 }
 0x630   :  { %v2907_v14 = vmul.f32 %v4926_v12, %v4910_v24 }
 0x632   :  { %v2929_v16 = vsel %vm891_vm5, %v2907_v14, -inf }
 0x633   :  { %2930 = vmax.xlane.f32.xlu0 %v2929_v16 }
 0x6af   :  { %v2910_v17 = vpop.xlane.xlu1 %2909 }
 0x6b0   :  { %v2932_v18 = vsub.f32 %v2893_v37, %v2910_v17 }
 0x6b2   :  { %v2940_v19 = vmul.f32 1.442695, %v2932_v18 }
 0x6b3   :  { %v2916_v22 = vpop.xlane.xlu1 %2915 }
 0x6b4   :  { %4927 = vpow2.f32 %v2940_v19  ;;  %v2934_v23 = vsub.f32 %v2897_v57, %v2916_v22  ;;  %v2913_v25 = vpop.xlane.xlu0 %2912 }
 0x6b5   :  { %v2933_v20 = vsub.f32 %v2895_v60, %v2913_v25 }
 0x6b6   :  { %v2944_v21 = vmul.f32 1.442695, %v2934_v23 }
 0x6b7   :  { %v2942_v26 = vmul.f32 1.442695, %v2933_v20  ;;  %v2922_v3 = vpop.xlane.xlu1 %2921 }
 0x6b8   :  { %4929 = vpow2.f32 %v2944_v21  ;;  %v2936_v9 = vsub.f32 %v2901_v1, %v2922_v3  ;;  %v2919_v29 = vpop.xlane.xlu0 %2918 }
 0x6b9   :  { %4931 = vpow2.f32 %v2942_v26  ;;  %v2935_v31 = vsub.f32 %v2899_v4, %v2919_v29 }
 0x6ba   :  { %v2948_v24 = vmul.f32 1.442695, %v2936_v9 }
 0x6bb   :  { %v2946_v33 = vmul.f32 1.442695, %v2935_v31  ;;  %v2928_v35 = vpop.xlane.xlu1 %2927 }
 0x6bc   :  { %4933 = vpow2.f32 %v2948_v24  ;;  %v2938_v42 = vsub.f32 %v2905_v8, %v2928_v35  ;;  %v2925_v37 = vpop.xlane.xlu0 %2924  ;;  %v2997_v24 = vcombine.high %v5390_v47, %v5390_v47 }
 0x6bd   :  { %4935 = vpow2.f32 %v2946_v33  ;;  %v2937_v43 = vsub.f32 %v2903_v2, %v2925_v37 }
 0x6be   :  { %v4928_v45 = vpop.eup %4927  ;;  %v2952_v53 = vmul.f32 1.442695, %v2938_v42 }
 0x6bf   :  { %v2950_v57 = vmul.f32 1.442695, %v2937_v43  ;;  %v2956_v59 = vsel %vm891_vm5, %v4928_v45, 0.0 }
 0x6c0   :  { %4937 = vpow2.f32 %v2952_v53  ;;  %v2931_v60 = vpop.xlane.xlu0 %2930  ;;  %2957 = vadd.xlane.f32.xlu1 %v2956_v59 }
 0x6c1   :  { %4939 = vpow2.f32 %v2950_v57  ;;  %v2939_v62 = vsub.f32 %v2907_v14, %v2931_v60 }
 0x6c2   :  { %v4930_v63 = vpop.eup %4929 }
 0x6c3   :  { %v4932_v0 = vpop.eup %4931  ;;  %v2954_v41 = vmul.f32 1.442695, %v2939_v62  ;;  %v2962_v1 = vsel %vm891_vm5, %v4930_v63, 0.0 }
 0x6c4   :  { %2963 = vadd.xlane.f32.xlu1 %v2962_v1  ;;  %v2959_v4 = vsel %vm891_vm5, %v4932_v0, 0.0 }
 0x6c5   :  { %4941 = vpow2.f32 %v2954_v41  ;;  %2960 = vadd.xlane.f32.xlu0 %v2959_v4 }
 0x6c6   :  { %v4934_v5 = vpop.eup %4933 }
 0x6c7   :  { %v4936_v49 = vpop.eup %4935  ;;  %v2968_v61 = vsel %vm891_vm5, %v4934_v5, 0.0 }
 0x6c8   :  { %2969 = vadd.xlane.f32.xlu1 %v2968_v61  ;;  %v2965_v6 = vsel %vm891_vm5, %v4936_v49, 0.0 }
 0x6c9   :  { %2966 = vadd.xlane.f32.xlu0 %v2965_v6 }
 0x6ca   :  { %v4938_v8 = vpop.eup %4937 }
 0x6cb   :  { %v4940_v2 = vpop.eup %4939  ;;  %v2974_v10 = vsel %vm891_vm5, %v4938_v8, 0.0 }
 0x6cc   :  { %2975 = vadd.xlane.f32.xlu1 %v2974_v10  ;;  %v2971_v11 = vsel %vm891_vm5, %v4940_v2, 0.0  ;;  %v5041_v10 = vld [vmem:[%s6100_s0 + $0x8] sm:$0xf] }
 0x6cd   :  { %2972 = vadd.xlane.f32.xlu0 %v2971_v11 }
 0x6cf   :  { %v4942_v12 = vpop.eup %4941 }
 0x6d0   :  { %v2977_v14 = vsel %vm891_vm5, %v4942_v12, 0.0 }
 0x6d1   :  { %2978 = vadd.xlane.f32.xlu0 %v2977_v14 }
 0x74d   :  { %v2958_v16 = vpop.xlane.xlu1 %2957 }
 0x74e   :  { %4943 = vrcp.f32 %v2958_v16 }
 0x751   :  { %v2964_v17 = vpop.xlane.xlu1 %2963 }
 0x752   :  { %4945 = vrcp.f32 %v2964_v17  ;;  %v2961_v18 = vpop.xlane.xlu0 %2960 }
 0x753   :  { %4947 = vrcp.f32 %v2961_v18 }
 0x755   :  { %v2970_v19 = vpop.xlane.xlu1 %2969 }
 0x756   :  { %4949 = vrcp.f32 %v2970_v19  ;;  %v2967_v22 = vpop.xlane.xlu0 %2966 }
 0x757   :  { %4951 = vrcp.f32 %v2967_v22 }
 0x758   :  { %v4944_v23 = vpop.eup %4943 }
 0x759   :  { %v2981_v25 = vmul.f32 %v4944_v23, %v4928_v45  ;;  %v2976_v20 = vpop.xlane.xlu1 %2975 }
 0x75a   :  { %4953 = vrcp.f32 %v2976_v20  ;;  %v2973_v21 = vpop.xlane.xlu0 %2972 }
 0x75b   :  { %4955 = vrcp.f32 %v2973_v21  ;;  %4807 = vmatmul.mubr.msk.f32.vlgmr.msra.gmra.mrb[38].mxu0 %vm280_vm2, %v2981_v25  ;;  %v5043_v25 = vld [vmem:[%s6100_s0 + $0x10] sm:$0xf]  ;;  %v5044_v21 = vld [vmem:[%s6100_s0 + $0x14] sm:$0xf] }
 0x75c   :  { %v4946_v26 = vpop.eup %4945  ;;  %4815 = vmatpush3.msk.msra.mxu0 %vm3003_vm3, %v5390_v47  ;;  %4816 = vmatprep.mubr.msk.f32.mxu0 %vm5102_vm1, %v5101_v15  ;;  %v2998_v47 = vcombine.high %v5404_v55, %v5404_v55 }
 0x75d   :  { %v4948_v3 = vpop.eup %4947  ;;  %v2985_v9 = vmul.f32 %v4946_v26, %v4930_v63  ;;  %4824 = vmatprep.subr.mxu0 %v5101_v15 }
 0x75e   :  { %v2983_v29 = vmul.f32 %v4948_v3, %v4932_v0  ;;  %v2979_v31 = vpop.xlane.xlu0 %2978 }
 0x75f   :  { %4957 = vrcp.f32 %v2979_v31  ;;  %4817 = vmatmul.mubr.msk.f32.vlgmr.msra.gmra.mrb[40].mxu0 %vm280_vm2, %v2985_v9 }
 0x760   :  { %v4950_v33 = vpop.eup %4949  ;;  %4812 = vmatmul.mubr.msk.f32.vlgmr.msra.gmra.mrb[38].mxu1 %vm280_vm2, %v2983_v29  ;;  %4825 = vmatpush3.msk.msra.mxu0 %vm3003_vm3, %v5404_v55  ;;  %v2999_v55 = vcombine.high %v5397_v51, %v5397_v51 }
 0x761   :  { %v4952_v35 = vpop.eup %4951  ;;  %v2989_v42 = vmul.f32 %v4950_v33, %v4934_v5  ;;  %4820 = vmatpush3.msk.msra.mxu1 %vm3003_vm3, %v2997_v24  ;;  %4821 = vmatprep.mubr.msk.f32.mxu1 %vm5102_vm1, %v5101_v15  ;;  %v5040_v5 = vld [vmem:[%s6100_s0 + $0x4] sm:$0xf]  ;;  %v5045_v24 = vld [vmem:[%s6100_s0 + $0x18] sm:$0xf] }
 0x762   :  { %v2987_v37 = vmul.f32 %v4952_v35, %v4936_v49  ;;  %4826 = vmatprep.mubr.msk.f32.mxu0 %vm5102_vm1, %v5101_v15  ;;  %4829 = vmatprep.subr.mxu1 %v5101_v15  ;;  %v5046_v35 = vld [vmem:[%s6100_s0 + $0x1c] sm:$0xf] }
 0x763   :  { %4834 = vmatprep.subr.mxu0 %v5101_v15  ;;  %4827 = vmatmul.mubr.msk.f32.vlgmr.msra.gmra.mrb[42].mxu0 %vm280_vm2, %v2989_v42 }
 0x764   :  { %v4954_v43 = vpop.eup %4953  ;;  %4822 = vmatmul.mubr.msk.f32.vlgmr.msra.gmra.mrb[40].mxu1 %vm280_vm2, %v2987_v37  ;;  %4835 = vmatpush3.msk.msra.mxu0 %vm3003_vm3, %v5397_v51  ;;  %v5039_v51 = vld [vmem:[%s6100_s0] sm:$0xf] }
 0x765   :  { %v4956_v45 = vpop.eup %4955  ;;  %v2993_v53 = vmul.f32 %v4954_v43, %v4938_v8  ;;  %4830 = vmatpush3.msk.msra.mxu1 %vm3003_vm3, %v2998_v47  ;;  %4831 = vmatprep.mubr.msk.f32.mxu1 %vm5102_vm1, %v5101_v15 }
 0x766   :  { %v2991_v57 = vmul.f32 %v4956_v45, %v4940_v2  ;;  %4836 = vmatprep.mubr.msk.f32.mxu0 %vm5102_vm1, %v5101_v15  ;;  %4839 = vmatprep.subr.mxu1 %v5101_v15 }
 0x767   :  { %4837 = vmatmul.mubr.msk.f32.vlgmr.msra.gmra.mrb[44].mxu0 %vm280_vm2, %v2993_v53  ;;  %v5105_v53 = vmov 839922192  }
 0x768   :  { %4832 = vmatmul.mubr.msk.f32.vlgmr.msra.gmra.mrb[42].mxu1 %vm280_vm2, %v2991_v57  ;;  %v3647_v57 = vunpack.c.l.s4 %v5105_v53 }
 0x769   :  { %v4958_v59 = vpop.eup %4957  ;;  %4840 = vmatpush3.msk.msra.mxu1 %vm3003_vm3, %v2999_v55  ;;  %4841 = vmatprep.mubr.msk.f32.mxu1 %vm5102_vm1, %v5101_v15  ;;  %v5106_v55 = vmov 1985246804  }
 0x76a   :  { %v2995_v60 = vmul.f32 %v4958_v59, %v4942_v12  ;;  %v5042_v12 = vld [vmem:[%s6100_s0 + $0xc] sm:$0xf]  ;;  %v3654_v59 = vunpack.c.l.s4 %v5106_v55  ;;  %s5107_s0 = smov 56  }
 0x76c   :  { %4842 = vmatmul.mubr.msk.f32.vlgmr.msra.gmra.mrb[44].mxu1 %vm280_vm2, %v2995_v60  ;;  %v3648_v60 = vunpack.c.0.s8 %v3647_v57 }
 0x82e   :  { %v3072_v62 = vpop.f32.mrb[38].mxu0 }
 0x82f   :  { %v4808_v63 = vpop.f32.mrb[39].mxu0  ;;  %v3601_v4 = vadd.f32 %v5039_v51, %v3072_v62  ;;  %v3655_v62 = vunpack.c.0.s8 %v3654_v59 }
 0x830   :  { %v5590_v63 = vsub.s32 %v3648_v60, %v5465_v27  ;;  %v874_v60 = vmul.f32 0.5, %v5301_v46 }
 0x832   :  { %v3222_v0 = vpop.f32.mrb[40].mxu0 }
 0x833   :  { %v3147_v41 = vpop.f32.mrb[38].mxu1  ;;  %v4818_v1 = vpop.f32.mrb[41].mxu0  ;;  %v3603_v11 = vadd.f32 %v5041_v10, %v3222_v0  ;;  %v5593_v0 = vsub.s32 %v3655_v62, %v5465_v27  ;;  %v873_v62 = vmul.f32 0.5, %v5299_v44 }
 0x834   :  { %v3602_v49 = vadd.f32 %v5040_v5, %v3147_v41  ;;  %v4813_v61 = vpop.f32.mrb[39].mxu1 }
 0x835   :  { %v5666_v44 = vsel %vm5468_vm4, -inf, %v873_v62 }
 0x836   :  { %v3372_v15 = vpop.f32.mrb[42].mxu0  ;;  %v3617_v6 = vcombine.low %v3601_v4, %v3602_v49 }
 0x837   :  { %v3297_v8 = vpop.f32.mrb[40].mxu1  ;;  %v4828_v2 = vpop.f32.mrb[43].mxu0  ;;  %v3605_v20 = vadd.f32 %v5043_v25, %v3372_v15 }
 0x838   :  { %v3604_v14 = vadd.f32 %v5042_v12, %v3297_v8  ;;  %v4823_v16 = vpop.f32.mrb[41].mxu1  ;;  %v3625_v17 = vsel %vm71_vm0, %v3617_v6, 0.0 }
 0x839   :  { %3626 = vadd.xlane.f32.xlu1 %v3625_v17 }
 0x83a   :  { %v3522_v18 = vpop.f32.mrb[44].mxu0  ;;  %v3618_v19 = vcombine.low %v3603_v11, %v3604_v14 }
 0x83b   :  { %v3447_v22 = vpop.f32.mrb[42].mxu1  ;;  %v4838_v23 = vpop.f32.mrb[45].mxu0  ;;  %v3607_v33 = vadd.f32 %v5045_v24, %v3522_v18 }
 0x83c   :  { %v3606_v26 = vadd.f32 %v5044_v21, %v3447_v22  ;;  %v4833_v3 = vpop.f32.mrb[43].mxu1  ;;  %v3628_v9 = vsel %vm71_vm0, %v3618_v19, 0.0 }
 0x83d   :  { %3629 = vadd.xlane.f32.xlu0 %v3628_v9 }
 0x83e   :  { %v3619_v29 = vcombine.low %v3605_v20, %v3606_v26 }
 0x83f   :  { %v3597_v31 = vpop.f32.mrb[44].mxu1 }
 0x840   :  { %v3608_v42 = vadd.f32 %v5046_v35, %v3597_v31  ;;  %v4843_v37 = vpop.f32.mrb[45].mxu1  ;;  %v3631_v47 = vsel %vm71_vm0, %v3619_v29, 0.0 }
 0x841   :  { %3632 = vadd.xlane.f32.xlu1 %v3631_v47 }
 0x842   :  { %v3620_v43 = vcombine.low %v3607_v33, %v3608_v42 }
 0x844   :  { %v3634_v45 = vsel %vm71_vm0, %v3620_v43, 0.0 }
 0x845   :  { %3635 = vadd.xlane.f32.xlu0 %v3634_v45 }
 0x852   :  { %3843 = vrot.lane.b32.xlu1 %v5362_v28, %s5104_s27 }
 0x8c6   :  { %v3627_v41 = vpop.xlane.xlu1 %3626 }
 0x8c7   :  { %v3638_v1 = vmul.f32 0.125, %v3627_v41  ;;  %v876_v41 = vmul.f32 0.5, %v5305_v50  ;;  %v892_v50 = vsel %vm891_vm5, %v5666_v44, -inf }
 0x8c9   :  { %v3652_v51 = vrot.slane %v3638_v1, %v5590_v63  ;;  %v3659_v5 = vrot.slane %v3638_v1, %v5593_v0  ;;  %v5654_v1 = vsel %vm5468_vm4, -inf, %v874_v60 }
 0x8ca   :  { %v3630_v61 = vpop.xlane.xlu0 %3629 }
 0x8cb   :  { %v5597_v15 = vsub.f32 %v3601_v4, %v3652_v51  ;;  %v5599_v6 = vsub.f32 %v3602_v49, %v3659_v5  ;;  %v3639_v8 = vmul.f32 0.125, %v3630_v61  ;;  %v895_v51 = vsel %vm891_vm5, %v5654_v1, -inf }
 0x8cc   :  { %v875_v5 = vmul.f32 0.5, %v5303_v48  ;;  %v878_v61 = vmul.f32 0.5, %v5309_v54  ;;  %v880_v48 = vmul.f32 0.5, %v5313_v58  ;;  %v1795_v58 = vmul.f32 0.5, %v5372_v13 }
 0x8cd   :  { %v3666_v2 = vrot.slane %v3639_v8, %v5590_v63  ;;  %v3673_v10 = vrot.slane %v3639_v8, %v5593_v0  ;;  %v3718_v27 = vmul.f32 %v5597_v15, %v5597_v15  ;;  %v3719_v12 = vmul.f32 %v5599_v6, %v5599_v6 }
 0x8ce   :  { %v3633_v16 = vpop.xlane.xlu1 %3632  ;;  %v877_v8 = vmul.f32 0.5, %v5307_v52  ;;  %v5676_v54 = vsel %vm5468_vm4, -inf, %v878_v61  ;;  %v879_v52 = vmul.f32 0.5, %v5311_v56  ;;  %v1794_v56 = vmul.f32 0.5, %v5370_v7 }
 0x8cf   :  { %v5607_v17 = vsub.f32 %v3603_v11, %v3666_v2  ;;  %v5609_v18 = vsub.f32 %v3604_v14, %v3673_v10  ;;  %v3640_v4 = vmul.f32 0.125, %v3633_v16  ;;  %v3734_v19 = vcombine.low %v3718_v27, %v3719_v12 }
 0x8d0   :  { %v5680_v2 = vsel %vm5468_vm4, -inf, %v875_v5  ;;  %v907_v10 = vsel %vm891_vm5, %v5676_v54, -inf  ;;  %v5690_v12 = vsel %vm5468_vm4, -inf, %v880_v48  ;;  %v5694_v16 = vsel %vm5468_vm4, -inf, %v877_v8 }
 0x8d1   :  { %v3680_v49 = vrot.slane %v3640_v4, %v5590_v63  ;;  %v3687_v22 = vrot.slane %v3640_v4, %v5593_v0  ;;  %v3742_v23 = vsel %vm71_vm0, %v3734_v19, 0.0  ;;  %v3720_v25 = vmul.f32 %v5607_v17, %v5607_v17 }
 0x8d2   :  { %3743 = vadd.xlane.f32.xlu1 %v3742_v23  ;;  %v3636_v21 = vpop.xlane.xlu0 %3635  ;;  %v3721_v3 = vmul.f32 %v5609_v18, %v5609_v18  ;;  %v898_v27 = vsel %vm891_vm5, %v5680_v2, -inf  ;;  %v913_v4 = vsel %vm891_vm5, %v5690_v12, -inf  ;;  %v904_v19 = vsel %vm891_vm5, %v5694_v16, -inf }
 0x8d3   :  { %v5618_v11 = vsub.f32 %v3605_v20, %v3680_v49  ;;  %v5620_v14 = vsub.f32 %v3606_v26, %v3687_v22  ;;  %v3641_v9 = vmul.f32 0.125, %v3636_v21  ;;  %v1797_v13 = vmul.f32 0.5, %v5376_v32 }
 0x8d4   :  { %v3735_v29 = vcombine.low %v3720_v25, %v3721_v3  ;;  %v5704_v49 = vsel %vm5468_vm4, -inf, %v1795_v58  ;;  %v5708_v22 = vsel %vm5468_vm4, -inf, %v879_v52  ;;  %v1796_v7 = vmul.f32 0.5, %v5374_v30 }
 0x8d5   :  { %v3694_v31 = vrot.slane %v3641_v9, %v5590_v63  ;;  %v3701_v24 = vrot.slane %v3641_v9, %v5593_v0  ;;  %v3722_v35 = vmul.f32 %v5618_v11, %v5618_v11  ;;  %v3723_v37 = vmul.f32 %v5620_v14, %v5620_v14 }
 0x8d6   :  { %v3745_v47 = vsel %vm71_vm0, %v3735_v29, 0.0  ;;  %v1813_v23 = vsel %vm891_vm5, %v5704_v49, -inf  ;;  %v910_v25 = vsel %vm891_vm5, %v5708_v22, -inf  ;;  %v5717_v32 = vsel %vm5468_vm4, -inf, %v1797_v13 }
 0x8d7   :  { %v5629_v43 = vsub.f32 %v3607_v33, %v3694_v31  ;;  %v5631_v20 = vsub.f32 %v3608_v42, %v3701_v24  ;;  %3746 = vadd.xlane.f32.xlu0 %v3745_v47  ;;  %v3736_v26 = vcombine.low %v3722_v35, %v3723_v37  ;;  %v5642_v33 = vcombine.high %v5362_v28, %v5362_v28  ;;  %v5047_v42 = vld [vmem:[#allocation2] sm:$0xff]  ;;  %v3989_v24 = vld [vmem:[%s6104_s4 + $0x8] sm:$0xff]  ;;  %v3844_v37 = vpop.permute.xlu1 %3843 }
 0x8d8   :  { %v5721_v21 = vsel %vm5468_vm4, -inf, %v1794_v56  ;;  %v1819_v3 = vsel %vm891_vm5, %v5717_v32, -inf  ;;  %v5729_v30 = vsel %vm5468_vm4, -inf, %v1796_v7  ;;  %v3988_v31 = vld [vmem:[%s6104_s4] sm:$0xff] }
 0x8d9   :  { %v3748_v45 = vsel %vm71_vm0, %v3736_v26, 0.0  ;;  %v3724_v53 = vmul.f32 %v5629_v43, %v5629_v43  ;;  %v3725_v57 = vmul.f32 %v5631_v20, %v5631_v20  ;;  %v1810_v9 = vsel %vm891_vm5, %v5721_v21, -inf }
 0x8da   :  { %3749 = vadd.xlane.f32.xlu1 %v3748_v45  ;;  %v1816_v29 = vsel %vm891_vm5, %v5729_v30, -inf  ;;  %v4866_v35 = vpack.c.bf16 %v3989_v24, %v3988_v31 }
 0x8db   :  { %v3737_v55 = vcombine.low %v3724_v53, %v3725_v57 }
 0x8dc   :  { %4867 = vmatprep.subr.bf16.mxu1 %v4866_v35 }
 0x8dd   :  { %v3751_v59 = vsel %vm71_vm0, %v3737_v55, 0.0  ;;  %4869 = vmatpush3.bf16.msra.mxu1 %v4866_v35 }
 0x8de   :  { %3752 = vadd.xlane.f32.xlu0 %v3751_v59 }
 0x8eb   :  { %3857 = vrot.lane.b32.xlu1 %v5362_v28, %s5107_s0 }
 0x8ef   :  { %3859 = vrot.lane.b32.xlu1 %v5642_v33, %s5107_s0 }
 0x8f3   :  { %3888 = vrot.lane.b32.xlu1 %v5362_v28, %s5108_s28 }
 0x8f4   :  { %3845 = vrot.lane.b32.xlu0 %v5642_v33, %s5104_s27 }
 0x8f8   :  { %3885 = vrot.lane.b32.xlu0 %v5047_v42, %s5108_s28 }
 0x8fc   :  { %3992 = vrot.lane.b32.xlu0 %v5362_v28, %s5109_s29  ;;  %v5662_v28 = vsel %vm5468_vm4, -inf, %v876_v41 }
 0x8fd   :  { %v901_v46 = vsel %vm891_vm5, %v5662_v28, -inf }
 0x917   :  { %896 = vmax.xlane.f32.xlu1 %v895_v51 }
 0x91b   :  { %902 = vmax.xlane.f32.xlu1 %v901_v46  ;;  %893 = vmax.xlane.f32.xlu0 %v892_v50 }
 0x91f   :  { %908 = vmax.xlane.f32.xlu1 %v907_v10  ;;  %899 = vmax.xlane.f32.xlu0 %v898_v27 }
 0x923   :  { %914 = vmax.xlane.f32.xlu1 %v913_v4  ;;  %905 = vmax.xlane.f32.xlu0 %v904_v19 }
 0x927   :  { %1814 = vmax.xlane.f32.xlu1 %v1813_v23  ;;  %911 = vmax.xlane.f32.xlu0 %v910_v25 }
 0x92b   :  { %1820 = vmax.xlane.f32.xlu1 %v1819_v3  ;;  %1811 = vmax.xlane.f32.xlu0 %v1810_v9 }
 0x92f   :  { %1817 = vmax.xlane.f32.xlu0 %v1816_v29 }
 0x95f   :  { %v3744_v47 = vpop.xlane.xlu1 %3743 }
 0x960   :  { %v3754_v26 = vmul.f32 0.125, %v3744_v47 }
 0x962   :  { %v3758_v45 = vadd.f32 1e-05, %v3754_v26 }
 0x964   :  { %4959 = vrsqrt.f32 %v3758_v45  ;;  %v3747_v53 = vpop.xlane.xlu0 %3746 }
 0x965   :  { %v3755_v57 = vmul.f32 0.125, %v3747_v53 }
 0x967   :  { %v3759_v55 = vadd.f32 1e-05, %v3755_v57  ;;  %v3750_v59 = vpop.xlane.xlu1 %3749 }
 0x968   :  { %v3756_v42 = vmul.f32 0.125, %v3750_v59 }
 0x969   :  { %4961 = vrsqrt.f32 %v3759_v55 }
 0x96a   :  { %v3760_v60 = vadd.f32 1e-05, %v3756_v42 }
 0x96b   :  { %v3753_v62 = vpop.xlane.xlu0 %3752  ;;  %v3858_v51 = vpop.permute.xlu1 %3857 }
 0x96c   :  { %4963 = vrsqrt.f32 %v3760_v60  ;;  %v3757_v41 = vmul.f32 0.125, %v3753_v62 }
 0x96e   :  { %v4960_v5 = vpop.eup %4959  ;;  %v3761_v61 = vadd.f32 1e-05, %v3757_v41 }
 0x96f   :  { %v3776_v46 = vrot.slane %v4960_v5, %v5590_v63  ;;  %v3783_v50 = vrot.slane %v4960_v5, %v5593_v0  ;;  %v3846_v8 = vpop.permute.xlu0 %3845  ;;  %v3860_v27 = vpop.permute.xlu1 %3859 }
 0x970   :  { %4965 = vrsqrt.f32 %v3761_v61 }
 0x971   :  { %v3834_v48 = vmul.f32 %v3776_v46, %v5597_v15  ;;  %v3835_v10 = vmul.f32 %v3783_v50, %v5599_v6 }
 0x973   :  { %v4962_v52 = vpop.eup %4961  ;;  %v3849_v58 = vmul.f32 %v3844_v37, %v3834_v48  ;;  %v3850_v4 = vmul.f32 %v3846_v8, %v3835_v10  ;;  %v3886_v19 = vpop.permute.xlu0 %3885 }
 0x974   :  { %v3790_v56 = vrot.slane %v4962_v52, %v5590_v63  ;;  %v3797_v13 = vrot.slane %v4962_v52, %v5593_v0  ;;  %4844 = vmatprep.subr.mxu0 %v3886_v19 }
 0x975   :  { %v5745_v23 = vadd.f32 %v3858_v51, %v3849_v58  ;;  %v5747_v25 = vadd.f32 %v3860_v27, %v3850_v4  ;;  %4845 = vmatpush3.msra.mxu0 %v3886_v19 }
 0x976   :  { %v4964_v7 = vpop.eup %4963  ;;  %v3836_v15 = vmul.f32 %v3790_v56, %v5607_v17  ;;  %v3837_v6 = vmul.f32 %v3797_v13, %v5609_v18 }
 0x977   :  { %v3804_v3 = vrot.slane %v4964_v7, %v5590_v63  ;;  %v3811_v9 = vrot.slane %v4964_v7, %v5593_v0  ;;  %v3880_v29 = vcombine.low %v5745_v23, %v5747_v25 }
 0x978   :  { %v3851_v31 = vmul.f32 %v3844_v37, %v3836_v15  ;;  %v3852_v24 = vmul.f32 %v3846_v8, %v3837_v6  ;;  %v3993_v6 = vpop.permute.xlu0 %3992 }
 0x979   :  { %v3838_v35 = vmul.f32 %v3804_v3, %v5618_v11  ;;  %v3839_v47 = vmul.f32 %v3811_v9, %v5620_v14  ;;  %4846 = vmatprep.mubr.msk.f32.mxu0 %vm71_vm0, %v3880_v29 }
 0x97a   :  { %v4966_v26 = vpop.eup %4965  ;;  %v3865_v45 = vadd.f32 %v3858_v51, %v3851_v31  ;;  %v3866_v17 = vadd.f32 %v3860_v27, %v3852_v24 }
 0x97b   :  { %v3853_v53 = vmul.f32 %v3844_v37, %v3838_v35  ;;  %v3818_v18 = vrot.slane %v4966_v26, %v5590_v63  ;;  %v3825_v57 = vrot.slane %v4966_v26, %v5593_v0  ;;  %v3854_v55 = vmul.f32 %v3846_v8, %v3839_v47 }
 0x97c   :  { %v3881_v59 = vcombine.low %v3865_v45, %v3866_v17 }
 0x97d   :  { %v3840_v42 = vmul.f32 %v3818_v18, %v5629_v43  ;;  %v5761_v60 = vadd.f32 %v3858_v51, %v3853_v53  ;;  %v3841_v11 = vmul.f32 %v3825_v57, %v5631_v20  ;;  %v5764_v62 = vadd.f32 %v3860_v27, %v3854_v55  ;;  %v3990_v20 = vld [vmem:[%s6104_s4 + $0x10] sm:$0xff] }
 0x97e   :  { %4847 = vmatmul.mubr.msk.f32.vlgmr.msra.gmra.mrb[46].mxu0 %vm71_vm0, %v3881_v59 }
 0x97f   :  { %v3855_v14 = vmul.f32 %v3844_v37, %v3840_v42  ;;  %v3856_v41 = vmul.f32 %v3846_v8, %v3841_v11  ;;  %v3882_v5 = vcombine.low %v5761_v60, %v5764_v62  ;;  %v3991_v37 = vld [vmem:[%s6104_s4 + $0x18] sm:$0xff]  ;;  %s5111_s4 = smov 40  }
 0x980   :  { %v4870_v50 = vpack.c.bf16 %v3991_v37, %v3990_v20 }
 0x981   :  { %v5769_v61 = vadd.f32 %v3858_v51, %v3855_v14  ;;  %v5771_v46 = vadd.f32 %v3860_v27, %v3856_v41  ;;  %4849 = vmatprep.mubr.msk.f32.mxu0 %vm71_vm0, %v3882_v5  ;;  %v3889_v51 = vpop.permute.xlu1 %3888 }
 0x982   :  { %4871 = vmatprep.subr.bf16.mxu1 %v4870_v50 }
 0x983   :  { %v3883_v43 = vcombine.low %v5769_v61, %v5771_v46  ;;  %4873 = vmatpush3.bf16.msra.mxu1 %v4870_v50 }
 0x985   :  { %4850 = vmatmul.mubr.msk.f32.gmra.mrb[48].mxu0 %vm71_vm0, %v3883_v43 }
 0x9a4   :  { %v897_v3 = vpop.xlane.xlu1 %896 }
 0x9a5   :  { %v917_v14 = vsub.f32 %v5654_v1, %v897_v3 }
 0x9a7   :  { %v926_v1 = vmul.f32 1.442695, %v917_v14 }
 0x9a8   :  { %v894_v9 = vpop.xlane.xlu0 %893  ;;  %v903_v29 = vpop.xlane.xlu1 %902 }
 0x9a9   :  { %v916_v20 = vsub.f32 %v5666_v44, %v894_v9  ;;  %4967 = vpow2.f32 %v926_v1 }
 0x9ac   :  { %v900_v24 = vpop.xlane.xlu0 %899  ;;  %v909_v59 = vpop.xlane.xlu1 %908 }
 0x9ad   :  { %v918_v44 = vsub.f32 %v5680_v2, %v900_v24 }
 0x9b0   :  { %v906_v41 = vpop.xlane.xlu0 %905 }
 0xa51   :  { %v4848_v8 = vpop.f32.mrb[46].mxu0 }
 0xa52   :  { %v3971_v48 = vadd.f32 %v4848_v8, %v3889_v51  ;;  %v3965_v10 = vpop.f32.mrb[47].mxu0  ;;  %v919_v8 = vsub.f32 %v5662_v28, %v903_v29 }
 0xa53   :  { %v3966_v27 = vadd.f32 %v3965_v10, %v3889_v51  ;;  %v924_v10 = vmul.f32 1.442695, %v916_v20 }
 0xa54   :  { %v3985_v58 = vmax.f32 %v3971_v48, 0.0 }
 0xa55   :  { %v3984_v52 = vmax.f32 %v3966_v27, 0.0  ;;  %v915_v27 = vpop.xlane.xlu1 %914  ;;  %4969 = vpow2.f32 %v924_v10 }
 0xa56   :  { %v923_v29 = vsub.f32 %v5690_v12, %v915_v27 }
 0xa57   :  { %4860 = vmatprep.mubr.msk.f32.mxu1 %vm3995_vm6, %v3984_v52 }
 0xa58   :  { %4861 = vmatmul.mubr.msk.f32.vlgmr.msra.gmra.mrb[46].mxu1 %vm3995_vm6, %v3985_v58  ;;  %v4851_v4 = vpop.f32.mrb[48].mxu0 }
 0xa59   :  { %v3981_v19 = vadd.f32 %v4851_v4, %v3889_v51  ;;  %v3975_v56 = vpop.f32.mrb[49].mxu0  ;;  %v1799_v4 = vmul.f32 0.5, %v5380_v36  ;;  %v928_v36 = vmul.f32 1.442695, %v918_v44  ;;  %v1815_v3 = vpop.xlane.xlu1 %1814 }
 0xa5a   :  { %v3976_v13 = vadd.f32 %v3975_v56, %v3889_v51 }
 0xa5b   :  { %v3987_v15 = vmax.f32 %v3981_v19, 0.0  ;;  %v912_v19 = vpop.xlane.xlu0 %911 }
 0xa5c   :  { %v3986_v7 = vmax.f32 %v3976_v13, 0.0  ;;  %v1798_v13 = vmul.f32 0.5, %v5378_v34  ;;  %v922_v24 = vsub.f32 %v5708_v22, %v912_v19  ;;  %v1835_v22 = vsub.f32 %v5704_v49, %v1815_v3 }
 0xa5e   :  { %4863 = vmatprep.mubr.msk.f32.mxu1 %vm3995_vm6, %v3986_v7  ;;  %v921_v7 = vsub.f32 %v5676_v54, %v909_v59  ;;  %v1800_v54 = vmul.f32 0.5, %v5382_v38  ;;  %v5833_v9 = vsel %vm5468_vm4, -inf, %v1798_v13  ;;  %v1844_v49 = vmul.f32 1.442695, %v1835_v22 }
 0xa5f   :  { %4864 = vmatmul.mubr.msk.f32.gmra.mrb[48].mxu1 %vm3995_vm6, %v3987_v15  ;;  %v1822_v38 = vsel %vm891_vm5, %v5833_v9, -inf }
 0xa60   :  { %v5847_v12 = vsel %vm5468_vm4, -inf, %v1800_v54 }
 0xa61   :  { %v1828_v39 = vsel %vm891_vm5, %v5847_v12, -inf }
 0xb2b   :  { %v4862_v31 = vpop.f32.mrb[46].mxu1 }
 0xb2c   :  { %v4080_v35 = vadd.f32 %v4862_v31, %v3993_v6  ;;  %v4074_v47 = vpop.f32.mrb[47].mxu1 }
 0xb2d   :  { %v4075_v26 = vadd.f32 %v4074_v47, %v3993_v6 }
 0xb2e   :  { %v4098_v53 = vcombine.high %v4080_v35, %v4080_v35  ;;  %v5783_v57 = vadd.f32 %v4080_v35, %v3865_v45 }
 0xb2f   :  { %v4097_v18 = vcombine.high %v4075_v26, %v4075_v26  ;;  %v5788_v42 = vadd.f32 %v4075_v26, %v5745_v23  ;;  %v938_v26 = vmul.f32 1.442695, %v923_v29 }
 0xb30   :  { %v5785_v55 = vadd.f32 %v4098_v53, %v3866_v17  ;;  %v936_v53 = vmul.f32 1.442695, %v922_v24 }
 0xb31   :  { %v5791_v11 = vadd.f32 %v4097_v18, %v5747_v25  ;;  %v1821_v18 = vpop.xlane.xlu1 %1820 }
 0xb32   :  { %v4865_v5 = vpop.f32.mrb[48].mxu1  ;;  %v4122_v43 = vcombine.low %v5783_v57, %v5785_v55  ;;  %v1837_v20 = vsub.f32 %v5717_v32, %v1821_v18 }
 0xb33   :  { %v4090_v45 = vadd.f32 %v4865_v5, %v3993_v6  ;;  %v4084_v37 = vpop.f32.mrb[49].mxu1  ;;  %v4121_v17 = vcombine.low %v5788_v42, %v5791_v11 }
 0xb34   :  { %v4085_v50 = vadd.f32 %v4084_v37, %v3993_v6  ;;  %v4132_v23 = vsel %vm71_vm0, %v4122_v43, 0.0  ;;  %v5828_v6 = vsel %vm5468_vm4, -inf, %v1799_v4 }
 0xb35   :  { %v4100_v51 = vcombine.high %v4090_v45, %v4090_v45  ;;  %4133 = vadd.xlane.f32.xlu0 %v4132_v23  ;;  %v4129_v25 = vsel %vm71_vm0, %v4121_v17, 0.0  ;;  %v5804_v52 = vadd.f32 %v4090_v45, %v5769_v61  ;;  %v930_v61 = vmul.f32 1.442695, %v919_v8 }
 0xb36   :  { %v4099_v48 = vcombine.high %v4085_v50, %v4085_v50  ;;  %4130 = vadd.xlane.f32.xlu1 %v4129_v25  ;;  %v5811_v56 = vadd.f32 %v4085_v50, %v5761_v60  ;;  %v920_v60 = vsub.f32 %v5694_v16, %v906_v41  ;;  %v934_v16 = vmul.f32 1.442695, %v921_v7  ;;  %v5853_v41 = vpop.eup %4967 }
 0xb37   :  { %v5807_v58 = vadd.f32 %v4100_v51, %v5771_v46  ;;  %4971 = vpow2.f32 %v930_v61  ;;  %v1825_v35 = vsel %vm891_vm5, %v5828_v6, -inf  ;;  %v5857_v43 = vpop.eup %4969  ;;  %v943_v37 = vsel %vm891_vm5, %v5853_v41, 0.0 }
 0xb38   :  { %v5814_v28 = vadd.f32 %v4099_v48, %v5764_v62  ;;  %v1801_v62 = vmul.f32 0.5, %v5384_v40  ;;  %v1812_v40 = vpop.xlane.xlu0 %1811  ;;  %4973 = vpow2.f32 %v928_v36  ;;  %v932_v31 = vmul.f32 1.442695, %v920_v60 }
 0xb39   :  { %v4124_v2 = vcombine.low %v5804_v52, %v5807_v58  ;;  %4975 = vpow2.f32 %v934_v16  ;;  %v1834_v59 = vsub.f32 %v5721_v21, %v1812_v40  ;;  %v940_v50 = vsel %vm891_vm5, %v5857_v43, 0.0 }
 0xb3a   :  { %v4123_v46 = vcombine.low %v5811_v56, %v5814_v28  ;;  %v5843_v47 = vsel %vm5468_vm4, -inf, %v1801_v62  ;;  %4977 = vpow2.f32 %v932_v31  ;;  %v1848_v51 = vmul.f32 1.442695, %v1837_v20 }
 0xb3b   :  { %v4138_v15 = vsel %vm71_vm0, %v4124_v2, 0.0  ;;  %v1831_v14 = vsel %vm891_vm5, %v5843_v47, -inf  ;;  %4979 = vpow2.f32 %v938_v26  ;;  %v1842_v45 = vmul.f32 1.442695, %v1834_v59 }
 0xb3c   :  { %4139 = vadd.xlane.f32.xlu1 %v4138_v15  ;;  %v4135_v34 = vsel %vm71_vm0, %v4123_v46, 0.0  ;;  %v1818_v5 = vpop.xlane.xlu0 %1817  ;;  %4981 = vpow2.f32 %v936_v53 }
 0xb3d   :  { %4136 = vadd.xlane.f32.xlu0 %v4135_v34  ;;  %v1836_v21 = vsub.f32 %v5729_v30, %v1818_v5  ;;  %4983 = vpow2.f32 %v1844_v49 }
 0xb3e   :  { %4985 = vpow2.f32 %v1842_v45 }
 0xb3f   :  { %v1846_v32 = vmul.f32 1.442695, %v1836_v21  ;;  %4987 = vpow2.f32 %v1848_v51 }
 0xb40   :  { %1826 = vmax.xlane.f32.xlu1 %v1825_v35 }
 0xb41   :  { %1823 = vmax.xlane.f32.xlu0 %v1822_v38  ;;  %v5863_v17 = vpop.eup %4971  ;;  %4989 = vpow2.f32 %v1846_v32 }
 0xb42   :  { %v5867_v23 = vpop.eup %4973  ;;  %v949_v25 = vsel %vm891_vm5, %v5863_v17, 0.0 }
 0xb43   :  { %v5871_v30 = vpop.eup %4975  ;;  %v946_v1 = vsel %vm891_vm5, %v5867_v23, 0.0 }
 0xb44   :  { %1832 = vmax.xlane.f32.xlu1 %v1831_v14  ;;  %v5875_v8 = vpop.eup %4977  ;;  %v955_v48 = vsel %vm891_vm5, %v5871_v30, 0.0 }
 0xb45   :  { %1829 = vmax.xlane.f32.xlu0 %v1828_v39  ;;  %v5879_v10 = vpop.eup %4979  ;;  %v952_v44 = vsel %vm891_vm5, %v5875_v8, 0.0 }
 0xb46   :  { %v5883_v27 = vpop.eup %4981  ;;  %v961_v4 = vsel %vm891_vm5, %v5879_v10, 0.0 }
 0xb47   :  { %v5887_v19 = vpop.eup %4983  ;;  %v958_v13 = vsel %vm891_vm5, %v5883_v27, 0.0 }
 0xb48   :  { %944 = vadd.xlane.f32.xlu1 %v943_v37  ;;  %v5891_v2 = vpop.eup %4985  ;;  %v1861_v61 = vsel %vm891_vm5, %v5887_v19, 0.0 }
 0xb49   :  { %941 = vadd.xlane.f32.xlu0 %v940_v50  ;;  %v5895_v7 = vpop.eup %4987  ;;  %v1858_v46 = vsel %vm891_vm5, %v5891_v2, 0.0 }
 0xb4a   :  { %v1867_v60 = vsel %vm891_vm5, %v5895_v7, 0.0 }
 0xb4b   :  { %v5899_v36 = vpop.eup %4989 }
 0xb4c   :  { %950 = vadd.xlane.f32.xlu1 %v949_v25  ;;  %v1864_v15 = vsel %vm891_vm5, %v5899_v36, 0.0 }
 0xb4d   :  { %947 = vadd.xlane.f32.xlu0 %v946_v1 }
 0xb50   :  { %956 = vadd.xlane.f32.xlu1 %v955_v48 }
 0xb51   :  { %953 = vadd.xlane.f32.xlu0 %v952_v44 }
 0xb54   :  { %962 = vadd.xlane.f32.xlu1 %v961_v4 }
 0xb55   :  { %959 = vadd.xlane.f32.xlu0 %v958_v13 }
 0xb58   :  { %1862 = vadd.xlane.f32.xlu1 %v1861_v61 }
 0xb59   :  { %1859 = vadd.xlane.f32.xlu0 %v1858_v46 }
 0xb5c   :  { %1868 = vadd.xlane.f32.xlu1 %v1867_v60 }
 0xb5d   :  { %1865 = vadd.xlane.f32.xlu0 %v1864_v15 }
 0xbc2   :  { %v4134_v34 = vpop.xlane.xlu0 %4133 }
 0xbc3   :  { %v4131_v62 = vpop.xlane.xlu1 %4130  ;;  %v4142_v24 = vmul.f32 0.125, %v4134_v34 }
 0xbc4   :  { %v4141_v35 = vmul.f32 0.125, %v4131_v62 }
 0xbc5   :  { %v4169_v14 = vrot.slane %v4142_v24, %v5590_v63  ;;  %v4176_v5 = vrot.slane %v4142_v24, %v5593_v0 }
 0xbc9   :  { %v4140_v54 = vpop.xlane.xlu1 %4139 }
 0xbca   :  { %v4137_v3 = vpop.xlane.xlu0 %4136  ;;  %v4144_v49 = vmul.f32 0.125, %v4140_v54 }
 0xbcb   :  { %v4143_v21 = vmul.f32 0.125, %v4137_v3 }
 0xbcc   :  { %v4197_v32 = vrot.slane %v4144_v49, %v5590_v63  ;;  %v4204_v25 = vrot.slane %v4144_v49, %v5593_v0 }
 0xbcd   :  { %v1827_v16 = vpop.xlane.xlu1 %1826  ;;  %v4183_v48 = vrot.slane %v4143_v21, %v5590_v63 }
 0xbce   :  { %v1839_v29 = vsub.f32 %v5828_v6, %v1827_v16  ;;  %v1824_v40 = vpop.xlane.xlu0 %1823  ;;  %v4155_v6 = vrot.slane %v4141_v35, %v5590_v63  ;;  %v5940_v61 = vsub.f32 %v5804_v52, %v4197_v32  ;;  %v5943_v46 = vsub.f32 %v5807_v58, %v4204_v25 }
 0xbcf   :  { %v1838_v31 = vsub.f32 %v5833_v9, %v1824_v40  ;;  %v4162_v9 = vrot.slane %v4141_v35, %v5593_v0  ;;  %v5950_v34 = vsub.f32 %v5811_v56, %v4183_v48 }
 0xbd0   :  { %v1852_v38 = vmul.f32 1.442695, %v1839_v29  ;;  %v5920_v50 = vsub.f32 %v5788_v42, %v4155_v6  ;;  %v4228_v24 = vmul.f32 %v5943_v46, %v5943_v46 }
 0xbd1   :  { %v1850_v26 = vmul.f32 1.442695, %v1838_v31  ;;  %v1833_v22 = vpop.xlane.xlu1 %1832  ;;  %v5923_v51 = vsub.f32 %v5791_v11, %v4162_v9 }
 0xbd2   :  { %4991 = vpow2.f32 %v1852_v38  ;;  %v1841_v53 = vsub.f32 %v5843_v47, %v1833_v22  ;;  %v1830_v18 = vpop.xlane.xlu0 %1829  ;;  %v5914_v47 = vsub.f32 %v5783_v57, %v4169_v14  ;;  %v4190_v57 = vrot.slane %v4143_v21, %v5593_v0 }
 0xbd3   :  { %4993 = vpow2.f32 %v1850_v26  ;;  %v1840_v59 = vsub.f32 %v5847_v12, %v1830_v18  ;;  %v5917_v12 = vsub.f32 %v5785_v55, %v4176_v5  ;;  %v4221_v4 = vmul.f32 %v5920_v50, %v5920_v50 }
 0xbd4   :  { %v1856_v39 = vmul.f32 1.442695, %v1841_v53  ;;  %v4223_v42 = vmul.f32 %v5914_v47, %v5914_v47  ;;  %v4222_v62 = vmul.f32 %v5923_v51, %v5923_v51  ;;  %v5953_v54 = vsub.f32 %v5814_v28, %v4190_v57 }
 0xbd5   :  { %v1854_v20 = vmul.f32 1.442695, %v1840_v59  ;;  %v945_v45 = vpop.xlane.xlu1 %944  ;;  %v4224_v11 = vmul.f32 %v5917_v12, %v5917_v12  ;;  %v4227_v28 = vmul.f32 %v5940_v61, %v5940_v61  ;;  %v4225_v22 = vmul.f32 %v5950_v34, %v5950_v34 }
 0xbd6   :  { %4995 = vpow2.f32 %v1856_v39  ;;  %v942_v37 = vpop.xlane.xlu0 %941  ;;  %v4237_v31 = vcombine.low %v4221_v4, %v4222_v62  ;;  %v4226_v53 = vmul.f32 %v5953_v54, %v5953_v54 }
 0xbd7   :  { %4997 = vpow2.f32 %v1854_v20  ;;  %v4238_v16 = vcombine.low %v4223_v42, %v4224_v11  ;;  %v4240_v20 = vcombine.low %v4227_v28, %v4228_v24 }
 0xbd8   :  { %4999 = vrcp.f32 %v945_v45  ;;  %v4245_v45 = vsel %vm71_vm0, %v4237_v31, 0.0  ;;  %v4239_v21 = vcombine.low %v4225_v22, %v4226_v53 }
 0xbd9   :  { %5001 = vrcp.f32 %v942_v37  ;;  %v951_v1 = vpop.xlane.xlu1 %950  ;;  %v4248_v49 = vsel %vm71_vm0, %v4238_v16, 0.0  ;;  %v4254_v25 = vsel %vm71_vm0, %v4240_v20, 0.0 }
 0xbda   :  { %5003 = vrcp.f32 %v951_v1  ;;  %v948_v55 = vpop.xlane.xlu0 %947  ;;  %v4251_v57 = vsel %vm71_vm0, %v4239_v21, 0.0 }
 0xbdb   :  { %5005 = vrcp.f32 %v948_v55 }
 0xbdc   :  { %v5929_v44 = vpop.eup %4991 }
 0xbdd   :  { %v5937_v13 = vpop.eup %4993  ;;  %v957_v60 = vpop.xlane.xlu1 %956  ;;  %v1873_v15 = vsel %vm891_vm5, %v5929_v44, 0.0 }
 0xbde   :  { %5007 = vrcp.f32 %v957_v60  ;;  %v954_v3 = vpop.xlane.xlu0 %953  ;;  %1874 = vadd.xlane.f32.xlu1 %v1873_v15  ;;  %v1870_v52 = vsel %vm891_vm5, %v5937_v13, 0.0 }
 0xbdf   :  { %5009 = vrcp.f32 %v954_v3  ;;  %1871 = vadd.xlane.f32.xlu0 %v1870_v52 }
 0xbe0   :  { %v5957_v58 = vpop.eup %4995 }
 0xbe1   :  { %v5959_v29 = vpop.eup %4997  ;;  %v963_v40 = vpop.xlane.xlu1 %962  ;;  %v1879_v56 = vsel %vm891_vm5, %v5957_v58, 0.0 }
 0xbe2   :  { %v5000_v35 = vpop.eup %4999  ;;  %5011 = vrcp.f32 %v963_v40  ;;  %v960_v38 = vpop.xlane.xlu0 %959  ;;  %1880 = vadd.xlane.f32.xlu1 %v1879_v56  ;;  %v1876_v26 = vsel %vm891_vm5, %v5959_v29, 0.0 }
 0xbe3   :  { %v5002_v18 = vpop.eup %5001  ;;  %v967_v59 = vmul.f32 %v5000_v35, %v5853_v41  ;;  %5013 = vrcp.f32 %v960_v38  ;;  %1877 = vadd.xlane.f32.xlu0 %v1876_v26 }
 0xbe4   :  { %v5004_v14 = vpop.eup %5003  ;;  %v965_v5 = vmul.f32 %v5002_v18, %v5857_v43 }
 0xbe5   :  { %v5006_v6 = vpop.eup %5005  ;;  %981 = vst.msk [vmem:[%s6106_s6 + $0x8] sm:$0xf] %vm891_vm5, %v967_v59  ;;  %v971_v39 = vmul.f32 %v5004_v14, %v5863_v17  ;;  %v1863_v9 = vpop.xlane.xlu1 %1862 }
 0xbe6   :  { %980 = vst.msk [vmem:[%s6106_s6] sm:$0xf] %vm891_vm5, %v965_v5  ;;  %v969_v41 = vmul.f32 %v5006_v6, %v5867_v23  ;;  %5015 = vrcp.f32 %v1863_v9  ;;  %v1860_v43 = vpop.xlane.xlu0 %1859  ;;  %4249 = vadd.xlane.f32.xlu1 %v4248_v49 }
 0xbe7   :  { %983 = vst.msk [vmem:[%s6106_s6 + $0x18] sm:$0xf] %vm891_vm5, %v971_v39  ;;  %5017 = vrcp.f32 %v1860_v43  ;;  %4246 = vadd.xlane.f32.xlu0 %v4245_v45 }
 0xbe8   :  { %v5008_v17 = vpop.eup %5007  ;;  %982 = vst.msk [vmem:[%s6106_s6 + $0x10] sm:$0xf] %vm891_vm5, %v969_v41 }
 0xbe9   :  { %v5010_v23 = vpop.eup %5009  ;;  %v975_v37 = vmul.f32 %v5008_v17, %v5871_v30  ;;  %v1869_v32 = vpop.xlane.xlu1 %1868 }
 0xbea   :  { %v973_v1 = vmul.f32 %v5010_v23, %v5875_v8  ;;  %5019 = vrcp.f32 %v1869_v32  ;;  %v1866_v48 = vpop.xlane.xlu0 %1865  ;;  %4255 = vadd.xlane.f32.xlu1 %v4254_v25 }
 0xbeb   :  { %985 = vst.msk [vmem:[%s6106_s6 + $0x28] sm:$0xf] %vm891_vm5, %v975_v37  ;;  %5021 = vrcp.f32 %v1866_v48  ;;  %4252 = vadd.xlane.f32.xlu0 %v4251_v57 }
 0xbec   :  { %v5012_v55 = vpop.eup %5011  ;;  %984 = vst.msk [vmem:[%s6106_s6 + $0x20] sm:$0xf] %vm891_vm5, %v973_v1 }
 0xbed   :  { %v5014_v30 = vpop.eup %5013  ;;  %v979_v8 = vmul.f32 %v5012_v55, %v5879_v10 }
 0xbee   :  { %v977_v42 = vmul.f32 %v5014_v30, %v5883_v27 }
 0xbef   :  { %987 = vst.msk [vmem:[%s6106_s6 + $0x38] sm:$0xf] %vm891_vm5, %v979_v8 }
 0xbf0   :  { %v5016_v11 = vpop.eup %5015  ;;  %986 = vst.msk [vmem:[%s6106_s6 + $0x30] sm:$0xf] %vm891_vm5, %v977_v42 }
 0xbf1   :  { %v5018_v4 = vpop.eup %5017  ;;  %v1885_v60 = vmul.f32 %v5016_v11, %v5887_v19  ;;  %v5048_v19 = vld [vmem:[%s6105_s5] ss:$0 sm:$0xff] }
 0xbf2   :  { %v1883_v15 = vmul.f32 %v5018_v4, %v5891_v2 }
 0xbf3   :  { %4456 = vst.msk [vmem:[%s6106_s6 + $0xc] sm:$0xf] %vm891_vm5, %v1885_v60 }
 0xbf4   :  { %v5020_v10 = vpop.eup %5019  ;;  %4455 = vst.msk [vmem:[%s6106_s6 + $0x4] sm:$0xf] %vm891_vm5, %v1883_v15 }
 0xbf5   :  { %v5022_v27 = vpop.eup %5021  ;;  %v1889_v62 = vmul.f32 %v5020_v10, %v5895_v7 }
 0xbf6   :  { %v1887_v3 = vmul.f32 %v5022_v27, %v5899_v36 }
 0xbf7   :  { %4458 = vst.msk [vmem:[%s6106_s6 + $0x1c] sm:$0xf] %vm891_vm5, %v1889_v62 }
 0xbf8   :  { %4457 = vst.msk [vmem:[%s6106_s6 + $0x14] sm:$0xf] %vm891_vm5, %v1887_v3 }
 0xbfb   :  { %4347 = vrot.lane.b32.xlu1 %v5642_v33, %s5110_s11 }
 0xbff   :  { %4359 = vrot.lane.b32.xlu1 %v5048_v19, %s5111_s4 }
 0xc01   :  { %4345 = vrot.lane.b32.xlu0 %v5048_v19, %s5110_s11 }
 0xc05   :  { %4361 = vrot.lane.b32.xlu0 %v5642_v33, %s5111_s4 }
 0xc6b   :  { %v1875_v2 = vpop.xlane.xlu1 %1874 }
 0xc6c   :  { %5023 = vrcp.f32 %v1875_v2  ;;  %v1872_v7 = vpop.xlane.xlu0 %1871 }
 0xc6d   :  { %5025 = vrcp.f32 %v1872_v7 }
 0xc6f   :  { %v1881_v36 = vpop.xlane.xlu1 %1880 }
 0xc70   :  { %5027 = vrcp.f32 %v1881_v36  ;;  %v1878_v52 = vpop.xlane.xlu0 %1877 }
 0xc71   :  { %5029 = vrcp.f32 %v1878_v52 }
 0xc73   :  { %v4250_v16 = vpop.xlane.xlu1 %4249 }
 0xc74   :  { %v4258_v40 = vmul.f32 0.125, %v4250_v16  ;;  %v4247_v56 = vpop.xlane.xlu0 %4246 }
 0xc75   :  { %v4257_v31 = vmul.f32 0.125, %v4247_v56 }
 0xc76   :  { %v5024_v28 = vpop.eup %5023  ;;  %v4262_v24 = vadd.f32 1e-05, %v4258_v40 }
 0xc77   :  { %v5026_v35 = vpop.eup %5025  ;;  %v1893_v38 = vmul.f32 %v5024_v28, %v5929_v44  ;;  %v4261_v26 = vadd.f32 1e-05, %v4257_v31  ;;  %v4256_v22 = vpop.xlane.xlu1 %4255 }
 0xc78   :  { %v1891_v33 = vmul.f32 %v5026_v35, %v5937_v13  ;;  %5031 = vrsqrt.f32 %v4262_v24  ;;  %v4260_v53 = vmul.f32 0.125, %v4256_v22  ;;  %v4253_v18 = vpop.xlane.xlu0 %4252 }
 0xc79   :  { %4460 = vst.msk [vmem:[%s6106_s6 + $0x2c] sm:$0xf] %vm891_vm5, %v1893_v38  ;;  %5033 = vrsqrt.f32 %v4261_v26  ;;  %v4259_v59 = vmul.f32 0.125, %v4253_v18 }
 0xc7a   :  { %v5028_v14 = vpop.eup %5027  ;;  %4459 = vst.msk [vmem:[%s6106_s6 + $0x24] sm:$0xf] %vm891_vm5, %v1891_v33  ;;  %v4264_v44 = vadd.f32 1e-05, %v4260_v53 }
 0xc7b   :  { %v5030_v5 = vpop.eup %5029  ;;  %v1897_v13 = vmul.f32 %v5028_v14, %v5957_v58  ;;  %v4263_v6 = vadd.f32 1e-05, %v4259_v59  ;;  %v4348_v49 = vpop.permute.xlu1 %4347 }
 0xc7c   :  { %v1895_v39 = vmul.f32 %v5030_v5, %v5959_v29  ;;  %5035 = vrsqrt.f32 %v4264_v44  ;;  %v4346_v9 = vpop.permute.xlu0 %4345 }
 0xc7d   :  { %4462 = vst.msk [vmem:[%s6106_s6 + $0x3c] sm:$0xf] %vm891_vm5, %v1897_v13  ;;  %5037 = vrsqrt.f32 %v4263_v6 }
 0xc7e   :  { %4461 = vst.msk [vmem:[%s6106_s6 + $0x34] sm:$0xf] %vm891_vm5, %v1895_v39  ;;  %s5112_s6 = smov [#allocation5]  }
 0xc7f   :  { %v4360_v1 = vpop.permute.xlu1 %4359  ;;  %s4389_s20 = sshll.u32 %s5112_s6, 4  ;;  %s4390_s20 = int_to_ptr.vmem [resolvable:$true] %s4389_s20 }
 0xc80   :  { %v4362_v32 = vpop.permute.xlu0 %4361  ;;  %s5071_s1 = scalar_lea.vmem %s4390_s20, 512  ;;  %p5076_p9 = scmp.lt.s32.totalorder %s4390_s20, %s4390_s20 }
 0xc81   :  { %p5072_p8 = scmp.ne.s32.totalorder %s4390_s20, %s5071_s1  ;;  %p5077_p10 = scmp.lt.s32.totalorder %s5071_s1, %s5071_s1 }
 0xc82   :  { %v5032_v20 = vpop.eup %5031 }
 0xc83   :  { %v5034_v41 = vpop.eup %5033  ;;  %v4300_v58 = vrot.slane %v5032_v20, %v5593_v0  ;;  %v4293_v29 = vrot.slane %v5032_v20, %v5590_v63  ;;  %p5078_p11 = por %p5077_p10, %p5076_p9 }
 0xc84   :  { %v4286_v43 = vrot.slane %v5034_v41, %v5593_v0  ;;  %v4279_v45 = vrot.slane %v5034_v41, %v5590_v63 }
 0xc85   :  { %v4340_v21 = vmul.f32 %v4300_v58, %v5917_v12  ;;  %v4339_v17 = vmul.f32 %v4293_v29, %v5914_v47  ;;  %p5079_p12 = pnand %p5078_p11, %p5072_p8 }
 0xc86   :  { %v5036_v23 = vpop.eup %5035  ;;  %v4338_v37 = vmul.f32 %v4286_v43, %v5923_v51  ;;  %v4337_v25 = vmul.f32 %v4279_v45, %v5920_v50 }
 0xc87   :  { %v5038_v48 = vpop.eup %5037  ;;  %v4328_v57 = vrot.slane %v5036_v23, %v5593_v0  ;;  %v4354_v55 = vmul.f32 %v4348_v49, %v4340_v21  ;;  %v4321_v30 = vrot.slane %v5036_v23, %v5590_v63  ;;  %v4353_v8 = vmul.f32 %v4346_v9, %v4339_v17 }
 0xc88   :  { %v4314_v42 = vrot.slane %v5038_v48, %v5593_v0  ;;  %v4352_v12 = vmul.f32 %v4348_v49, %v4338_v37  ;;  %v4307_v47 = vrot.slane %v5038_v48, %v5590_v63  ;;  %v4351_v11 = vmul.f32 %v4346_v9, %v4337_v25 }
 0xc89   :  { %v4344_v51 = vmul.f32 %v4328_v57, %v5943_v46  ;;  %v4368_v4 = vadd.f32 %v4362_v32, %v4354_v55  ;;  %v4343_v60 = vmul.f32 %v4321_v30, %v5940_v61  ;;  %v4367_v50 = vadd.f32 %v4360_v1, %v4353_v8 }
 0xc8a   :  { %v4342_v15 = vmul.f32 %v4314_v42, %v5953_v54  ;;  %v4366_v10 = vadd.f32 %v4362_v32, %v4352_v12  ;;  %v4341_v27 = vmul.f32 %v4307_v47, %v5950_v34  ;;  %v4365_v62 = vadd.f32 %v4360_v1, %v4351_v11 }
 0xc8b   :  { %v4358_v3 = vmul.f32 %v4348_v49, %v4344_v51  ;;  %4377 = vst.msk [vmem:[#allocation5 + $0xc] sm:$0xf] %vm4373_vm7, %v4368_v4  ;;  %v4357_v0 = vmul.f32 %v4346_v9, %v4343_v60  ;;  %4376 = vst.msk [vmem:[#allocation5 + $0x8] sm:$0xf] %vm4373_vm7, %v4367_v50 }
 0xc8c   :  { %v4356_v63 = vmul.f32 %v4348_v49, %v4342_v15  ;;  %4375 = vst.msk [vmem:[#allocation5 + $0x4] sm:$0xf] %vm4373_vm7, %v4366_v10  ;;  %v4355_v46 = vmul.f32 %v4346_v9, %v4341_v27  ;;  %4374 = vst.msk [vmem:[#allocation5] sm:$0xf] %vm4373_vm7, %v4365_v62 }
 0xc8d   :  { %v4372_v61 = vadd.f32 %v4362_v32, %v4358_v3  ;;  %v4371_v54 = vadd.f32 %v4360_v1, %v4357_v0 }
 0xc8e   :  { %v4370_v19 = vadd.f32 %v4362_v32, %v4356_v63  ;;  %v4369_v2 = vadd.f32 %v4360_v1, %v4355_v46 }
 0xc8f   :  { %4381 = vst.msk [vmem:[#allocation5 + $0x1c] sm:$0xf] %vm4373_vm7, %v4372_v61  ;;  %4380 = vst.msk [vmem:[#allocation5 + $0x18] sm:$0xf] %vm4373_vm7, %v4371_v54 }
 0xc90   :  { %4379 = vst.msk [vmem:[#allocation5 + $0x14] sm:$0xf] %vm4373_vm7, %v4370_v19  ;;  %4378 = vst.msk [vmem:[#allocation5 + $0x10] sm:$0xf] %vm4373_vm7, %v4369_v2 }
 0xc91   :  { %5082 = shalt.err (!%p5079_p12)
}
 0xc92   :  { %s5083_s23 = scalar_lea.hbm %s6107_s7, 512 }
 0xc93   :  { %p5084_p13 = scmp.ne.s32.totalorder %s6107_s7, %s5083_s23  ;;  %p5087_p0 = scmp.lt.u32.totalorder %s5083_s23, %s6107_s7 }
 0xc95   :  { %p5089_p1 = pnand %p5087_p0, %p5084_p13 }
 0xc97   :  { %5092 = shalt.err (!%p5089_p1)
}
 0xc98   :  { %s5113_s28 = smov 4  }
 0xc99   :  { %4395 = dma.vmem_to_hbm [thread:$0]  %s4390_s20, 512, %s6107_s7, [#allocation4], %s5104_s27, %s5104_s27, %s5113_s28  }
 0xc9a   :  { %5095 = dma.done.wait [#allocation4], 512  }
 0xc9b   :  { %5096 = vsyncadd [#allocation4], 4294966784 }
 0xc9c   :  { %4401 = vsyncpa [#allocation3], 1 }
 0xc9d   :  { %4402 = vsyncpa [#allocation4], 1 }

</bundles_post_ra>
